<compile_context>
chip_gen: v5e
topology: v5e:2x2
jax: 0.10.0
libtpu: 0.0.40
codegen_flags: <defaults>
</compile_context>

<pallas_src>
import functools

import jax
import jax.numpy as jnp
from jax.experimental import pallas as pl
from jax.experimental.pallas import tpu as pltpu

EPS = 1e-8
_LANE = 128
_CHUNK_ROWS = 16            # sublane alignment of the bf16 chunk blocks
_DEFAULT_TILE_ROWS = 512    # review item 8: keep 512 on every generation


def _round_up(x, m):
    return ((x + m - 1) // m) * m


def _cdiv(a, b):
    return -(-a // b)


def _hann_window(nfft):
    # torch.hann_window(nfft) (periodic): 0.5 * (1 - cos(2*pi*n/nfft))
    n = jnp.arange(nfft, dtype=jnp.float32)
    return 0.5 * (1.0 - jnp.cos(2.0 * jnp.pi * n / nfft))


def _windowed_dft_basis(nfft):
    """Hann-windowed fused [cos | -sin] DFT basis for bins 0 .. nfft//2 - 1.

    The Nyquist bin (purely real) is excluded and handled on the VPU, so each
    half is nfft//2 columns (a clean multiple of 128 for the module defaults)
    and the MXU spends no FLOPs on zero-padded columns (review item 4).
    """
    nreal = nfft // 2                          # Nyquist excluded
    half = _round_up(nreal, _LANE)
    n = jnp.arange(nfft, dtype=jnp.float32)[:, None]
    f = jnp.arange(nreal, dtype=jnp.float32)[None, :]
    ang = 2.0 * jnp.pi * n * f / nfft
    win = _hann_window(nfft)[:, None]
    basis = jnp.zeros((nfft, 2 * half), jnp.float32)
    basis = basis.at[:, :nreal].set(win * jnp.cos(ang))
    basis = basis.at[:, half:half + nreal].set(-win * jnp.sin(ang))
    return basis.astype(jnp.bfloat16), half


def _nyquist_rows(nfft, hop):
    """win[n] * (-1)^n cut into hop-sized rows (f32), padded to 8 sublanes."""
    ratio = nfft // hop
    n = jnp.arange(nfft, dtype=jnp.int32)
    sign = jnp.where(n % 2 == 0, 1.0, -1.0).astype(jnp.float32)
    rows = (_hann_window(nfft) * sign).reshape(ratio, hop)
    if ratio < 8:
        rows = jnp.pad(rows, ((0, 8 - ratio), (0, 0)))
    return rows                                            # (8, hop) f32


def _make_mag_kernel(tm, hop, ratio, n_frames, half):
    def kernel(pa_ref, pb_ref, ta_ref, tb_ref, basis_ref, nyq_ref, out_ref):
        t = pl.program_id(1)

        # bf16 end-to-end frame assembly (review item 1): stack this tile's own
        # hop-sized chunks with the 16-chunk edge block.  No f32 round trip and
        # no (tm, nfft) frames buffer is ever materialized (review item 2).
        p_stack = jnp.concatenate([pa_ref[0], pb_ref[0]], axis=0)   # (tm+16, hop) bf16
        t_stack = jnp.concatenate([ta_ref[0], tb_ref[0]], axis=0)   # (tm+16, hop) bf16

        p_acc = jnp.zeros((tm, 2 * half), jnp.float32)
        t_acc = jnp.zeros((tm, 2 * half), jnp.float32)
        p_nyq = jnp.zeros((tm, 1), jnp.float32)
        t_nyq = jnp.zeros((tm, 1), jnp.float32)

        # Decomposed frames @ basis matmul: one static, 128-aligned hop-wide
        # basis slice per j, ordered j-outer / {pred, target}-inner so the same
        # RHS feeds two back-to-back MXU matmuls (review items 2 & 3).
        for j in range(ratio):
            rhs = basis_ref[j * hop:(j + 1) * hop, :]               # (hop, 2*half) bf16
            p_lhs = p_stack[j:j + tm, :]                            # (tm, hop) bf16
            t_lhs = t_stack[j:j + tm, :]
            p_acc = p_acc + jnp.dot(p_lhs, rhs, preferred_element_type=jnp.float32)
            t_acc = t_acc + jnp.dot(t_lhs, rhs, preferred_element_type=jnp.float32)
            # Nyquist bin (purely real) on the VPU + XLU lane reduction, hidden
            # under the MXU matmuls (review item 4).
            nyq_j = nyq_ref[j:j + 1, :]                             # (1, hop) f32
            p_nyq = p_nyq + jnp.sum(p_lhs.astype(jnp.float32) * nyq_j,
                                    axis=-1, keepdims=True)
            t_nyq = t_nyq + jnp.sum(t_lhs.astype(jnp.float32) * nyq_j,
                                    axis=-1, keepdims=True)

        def magnitude(acc):
            re = acc[:, :half]
            im = acc[:, half:]
            # torch: clamp(abs(stft), min=eps)
            return jnp.maximum(jnp.sqrt(re * re + im * im), EPS)

        diff = jnp.abs(magnitude(p_acc) - magnitude(t_acc))         # (tm, half)
        nyq_diff = jnp.abs(jnp.maximum(jnp.abs(p_nyq), EPS)
                           - jnp.maximum(jnp.abs(t_nyq), EPS))      # (tm, 1)

        # Frame rows in [n_frames, n_frames + ratio - 1) hold real-but-different
        # reflected tail data for pred vs target, and rows beyond that are zero
        # padding -> the validity mask is required for correctness.
        row = t * tm + jax.lax.broadcasted_iota(jnp.int32, (tm, 1), 0)
        valid = (row < n_frames).astype(jnp.float32)
        tile_sum = jnp.sum(diff * valid) + jnp.sum(nyq_diff * valid)

        # Per-tile partial kept as a dense (8,128) VMEM block; an SMEM scalar
        # output (review item 9) is sub-us/step and riskier to lower.
        out_ref[...] = jnp.full(out_ref.shape, tile_sum, jnp.float32)

    return kernel


def _chunk_reference_channel(x, reference_channel, nfft, hop, n_frames, n_chunks_pad, ratio):
    """Reflect-pad the reference channel and cut it into hop-sized bf16 chunks."""
    xr = x[:, reference_channel, :].astype(jnp.float32)          # (B, T)
    pad = nfft // 2
    padded = jnp.pad(xr, ((0, 0), (pad, pad)), mode="reflect")   # (B, T + nfft)
    n_avail = n_frames + ratio - 1                               # chunks with real data
    chunks = padded[:, :n_avail * hop].reshape(xr.shape[0], n_avail, hop)
    chunks = jnp.pad(chunks, ((0, 0), (0, n_chunks_pad - n_avail), (0, 0)))
    return chunks.astype(jnp.bfloat16)


def _device_vmem_capacity_bytes():
    try:
        return int(pltpu.get_tpu_info().vmem_capacity_bytes)
    except Exception:
        return 64 << 20        # conservative: assume a v7x-class 64 MiB part


def _vmem_limit_bytes(tm, hop, nfft, half, vmem_cap):
    """Derive the scoped-VMEM limit from actual buffer sizes (review item 5)."""
    bf16, f32 = 2, 4
    # double-buffered pipeline blocks: pred/tgt main + edge, basis, nyq, output
    pipe = 2 * 2 * (tm + _CHUNK_ROWS) * hop * bf16
    pipe += 2 * nfft * (2 * half) * bf16
    pipe += 2 * 8 * hop * f32
    pipe += 2 * 8 * _LANE * f32
    # in-kernel live values: bf16 stacks, two f32 accumulators, mag/diff temps
    live = 2 * (tm + _CHUNK_ROWS) * hop * bf16
    live += 2 * tm * (2 * half) * f32
    live += 6 * tm * half * f32
    limit = pipe + live + (8 << 20)            # headroom for spills / internal scratch
    limit = max(limit, 32 << 20)               # never below the usual scoped default
    return int(min(limit, (vmem_cap * 3) // 4))  # <= ~48 MiB on 64-MiB (v7x) parts


@functools.partial(
    jax.jit,
    static_argnames=("nfft", "hop", "reference_channel", "tile_rows", "vmem_cap"))
def _wav_stft_mag_loss_impl(predicted, target, *, nfft, hop, reference_channel,
                            tile_rows, vmem_cap):
    predicted = predicted.astype(jnp.float32)
    target = target.astype(jnp.float32)
    B, _, T = predicted.shape

    ratio = nfft // hop
    nbins = nfft // 2 + 1
    n_frames = T // hop + 1                      # torch.stft(center=True) frame count

    tm = min(tile_rows, _round_up(n_frames, _CHUNK_ROWS))
    # v7x megacore (review item 6): guarantee >= 2 grid steps whenever possible
    # so both TensorCores get work.
    if B * _cdiv(n_frames, tm) < 2 and n_frames > _CHUNK_ROWS:
        tm = _round_up(_cdiv(n_frames, 2), _CHUNK_ROWS)
    n_tiles = _cdiv(n_frames, tm)
    n_chunks_pad = n_tiles * tm + _CHUNK_ROWS

    pred_chunks = _chunk_reference_channel(
        predicted, reference_channel, nfft, hop, n_frames, n_chunks_pad, ratio)
    tgt_chunks = _chunk_reference_channel(
        target, reference_channel, nfft, hop, n_frames, n_chunks_pad, ratio)
    basis, half = _windowed_dft_basis(nfft)
    nyq = _nyquist_rows(nfft, hop)

    # Chunk arrays are passed twice (same HBM buffer): a (tm, hop) block holding
    # the tile's own chunks plus a 16-chunk "edge" block supplying the ratio-1
    # extra chunks needed by the tile's last frames.
    main_spec = pl.BlockSpec((1, tm, hop), lambda b, t: (b, t, 0))
    edge_spec = pl.BlockSpec((1, _CHUNK_ROWS, hop),
                             lambda b, t: (b, (t + 1) * (tm // _CHUNK_ROWS), 0))
    # TODO(synk): pipeline_mode=pl.Buffered(1) on the two constant operands would
    # halve their resident VMEM (review item 7); left double-buffered for
    # robustness since they are small at the module default nfft=512.
    basis_spec = pl.BlockSpec((nfft, 2 * half), lambda b, t: (0, 0))
    nyq_spec = pl.BlockSpec((8, hop), lambda b, t: (0, 0))
    out_spec = pl.BlockSpec((1, 1, 8, _LANE), lambda b, t: (b, t, 0, 0))

    partials = pl.pallas_call(
        _make_mag_kernel(tm, hop, ratio, n_frames, half),
        out_shape=jax.ShapeDtypeStruct((B, n_tiles, 8, _LANE), jnp.float32),
        grid=(B, n_tiles),
        in_specs=[main_spec, edge_spec, main_spec, edge_spec, basis_spec, nyq_spec],
        out_specs=out_spec,
        compiler_params=pltpu.CompilerParams(
            dimension_semantics=("parallel", "parallel"),
            vmem_limit_bytes=_vmem_limit_bytes(tm, hop, nfft, half, vmem_cap),
        ),
    )(pred_chunks, pred_chunks, tgt_chunks, tgt_chunks, basis, nyq)

    mag_loss = jnp.sum(partials[:, :, 0, 0]) / (B * n_frames * nbins)
    # wav L1 term: trivially memory-bound reduction over the full (B, C, T)
    # tensors; kept in plain JAX per perf review (no benefit to VMEM residency).
    wav_loss = jnp.mean(jnp.abs(predicted - target))
    return wav_loss + mag_loss


def wav_stft_mag_loss(predicted, target, *, nfft=512, hop=256, reference_channel=0,
                      tile_rows=None):
    """predicted / target: (batch, channels, time). Matches WavSTFTMagLoss.forward."""
    if nfft % hop != 0 or not (1 <= nfft // hop <= 8):
        # TODO(synk): general hop (nfft % hop != 0 or nfft//hop > 8) would need the
        # gather-based framing path; the module default (nfft=512, hop=256) is covered.
        raise NotImplementedError("requires nfft to be a multiple of hop, nfft//hop <= 8")
    if hop % _LANE != 0:
        # Lane-sparse chunk rows (hop not a multiple of 128) are a silent 2-4x
        # perf cliff on every generation (review item 10) -> reject explicitly.
        raise NotImplementedError("requires hop to be a multiple of 128")
    vmem_cap = _device_vmem_capacity_bytes()
    if tile_rows is None:
        tile_rows = _DEFAULT_TILE_ROWS
    if vmem_cap < (100 << 20):
        # v7x-class parts (64 MiB VMEM per TensorCore): cap the row tile (item 5).
        tile_rows = min(tile_rows, 512)
    tile_rows = max(_CHUNK_ROWS, _round_up(int(tile_rows), _CHUNK_ROWS))
    return _wav_stft_mag_loss_impl(
        predicted, target, nfft=nfft, hop=hop,
        reference_channel=reference_channel,
        tile_rows=int(tile_rows), vmem_cap=int(vmem_cap))


if __name__ == "__main__":
    key = jax.random.PRNGKey(0)
    k1, k2 = jax.random.split(key)

    B, C, T = 2, 2, 2048       # small, consistent with nfft=512 / hop=256
    predicted = jax.random.normal(k1, (B, C, T), dtype=jnp.float32)
    target = jax.random.normal(k2, (B, C, T), dtype=jnp.float32)

    loss = wav_stft_mag_loss(predicted, target)
    jax.block_until_ready(loss)
    print("KERNEL_OK")
</pallas_src>

<mosaic_0001>
module attributes {stable_mosaic.version = 11 : i64} {
  func.func @kernel(%arg0: i32, %arg1: i32, %arg2: memref<1x16x256xbf16, #tpu.memory_space<vmem>>, %arg3: memref<1x16x256xbf16, #tpu.memory_space<vmem>>, %arg4: memref<1x16x256xbf16, #tpu.memory_space<vmem>>, %arg5: memref<1x16x256xbf16, #tpu.memory_space<vmem>>, %arg6: memref<512x512xbf16, #tpu.memory_space<vmem>>, %arg7: memref<8x256xf32, #tpu.memory_space<vmem>>, %arg8: memref<1x1x8x128xf32, #tpu.memory_space<vmem>>) attributes {dimension_semantics = [#tpu.dimension_semantics<parallel>, #tpu.dimension_semantics<parallel>], iteration_bounds = array<i64: 2, 1>, scalar_prefetch = 0 : i64, scratch_operands = 0 : i64, tpu.core_type = #tpu.core_type<tc>, window_params = [{transform_indices = @transform_0, window_bounds = array<i64: 1, 16, 256>}, {transform_indices = @transform_1, window_bounds = array<i64: 1, 16, 256>}, {transform_indices = @transform_2, window_bounds = array<i64: 1, 16, 256>}, {transform_indices = @transform_3, window_bounds = array<i64: 1, 16, 256>}, {pipeline_mode = #tpu.pipeline_mode<synchronous>, transform_indices = @transform_4, window_bounds = array<i64: 512, 512>}, {pipeline_mode = #tpu.pipeline_mode<synchronous>, transform_indices = @transform_5, window_bounds = array<i64: 8, 256>}, {transform_indices = @transform_6, window_bounds = array<i64: 1, 1, 8, 128>}]} {
    %c0 = arith.constant 0 : index
    %c0_0 = arith.constant 0 : index
    %c0_1 = arith.constant 0 : index
    %0 = vector.load %arg2[%c0, %c0_0, %c0_1] : memref<1x16x256xbf16, #tpu.memory_space<vmem>>, vector<1x16x256xbf16>
    %1 = vector.shape_cast %0 : vector<1x16x256xbf16> to vector<16x256xbf16>
    %c0_2 = arith.constant 0 : index
    %c0_3 = arith.constant 0 : index
    %c0_4 = arith.constant 0 : index
    %2 = vector.load %arg3[%c0_2, %c0_3, %c0_4] : memref<1x16x256xbf16, #tpu.memory_space<vmem>>, vector<1x16x256xbf16>
    %3 = vector.shape_cast %2 : vector<1x16x256xbf16> to vector<16x256xbf16>
    %4 = tpu.concatenate %1, %3 in 0 : vector<16x256xbf16>, vector<16x256xbf16> -> vector<32x256xbf16>
    %c0_5 = arith.constant 0 : index
    %c0_6 = arith.constant 0 : index
    %c0_7 = arith.constant 0 : index
    %5 = vector.load %arg4[%c0_5, %c0_6, %c0_7] : memref<1x16x256xbf16, #tpu.memory_space<vmem>>, vector<1x16x256xbf16>
    %6 = vector.shape_cast %5 : vector<1x16x256xbf16> to vector<16x256xbf16>
    %c0_8 = arith.constant 0 : index
    %c0_9 = arith.constant 0 : index
    %c0_10 = arith.constant 0 : index
    %7 = vector.load %arg5[%c0_8, %c0_9, %c0_10] : memref<1x16x256xbf16, #tpu.memory_space<vmem>>, vector<1x16x256xbf16>
    %8 = vector.shape_cast %7 : vector<1x16x256xbf16> to vector<16x256xbf16>
    %9 = tpu.concatenate %6, %8 in 0 : vector<16x256xbf16>, vector<16x256xbf16> -> vector<32x256xbf16>
    %cst = arith.constant 0.000000e+00 : f32
    %10 = vector.broadcast %cst : f32 to vector<16x512xf32>
    %cst_11 = arith.constant 0.000000e+00 : f32
    %11 = vector.broadcast %cst_11 : f32 to vector<16x512xf32>
    %cst_12 = arith.constant 0.000000e+00 : f32
    %12 = vector.broadcast %cst_12 : f32 to vector<16x1xf32>
    %cst_13 = arith.constant 0.000000e+00 : f32
    %13 = vector.broadcast %cst_13 : f32 to vector<16x1xf32>
    %c0_14 = arith.constant 0 : index
    %c0_15 = arith.constant 0 : index
    %14 = vector.load %arg6[%c0_14, %c0_15] : memref<512x512xbf16, #tpu.memory_space<vmem>>, vector<256x512xbf16>
    %15 = vector.extract_strided_slice %4 {offsets = [0, 0], sizes = [16, 256], strides = [1, 1]} : vector<32x256xbf16> to vector<16x256xbf16>
    %16 = vector.extract_strided_slice %9 {offsets = [0, 0], sizes = [16, 256], strides = [1, 1]} : vector<32x256xbf16> to vector<16x256xbf16>
    %cst_16 = arith.constant dense<0.000000e+00> : vector<16x512xf32>
    %17 = tpu.matmul %15, %14, %cst_16 {dimension_numbers = #tpu.dot_dimension_numbers<[1], [0], [0], [1], [0, 0, 1, 1], [], []>} : vector<16x256xbf16>, vector<256x512xbf16>, vector<16x512xf32> -> vector<16x512xf32>
    %18 = arith.addf %10, %17 : vector<16x512xf32>
    %cst_17 = arith.constant dense<0.000000e+00> : vector<16x512xf32>
    %19 = tpu.matmul %16, %14, %cst_17 {dimension_numbers = #tpu.dot_dimension_numbers<[1], [0], [0], [1], [0, 0, 1, 1], [], []>} : vector<16x256xbf16>, vector<256x512xbf16>, vector<16x512xf32> -> vector<16x512xf32>
    %20 = arith.addf %11, %19 : vector<16x512xf32>
    %c0_18 = arith.constant 0 : index
    %c0_19 = arith.constant 0 : index
    %21 = vector.load %arg7[%c0_18, %c0_19] : memref<8x256xf32, #tpu.memory_space<vmem>>, vector<1x256xf32>
    %22 = arith.extf %15 : vector<16x256xbf16> to vector<16x256xf32>
    %23 = vector.broadcast %21 : vector<1x256xf32> to vector<16x256xf32>
    %24 = arith.mulf %22, %23 : vector<16x256xf32>
    %cst_20 = arith.constant dense<0.000000e+00> : vector<16xf32>
    %25 = vector.multi_reduction <add>, %24, %cst_20 [1] : vector<16x256xf32> to vector<16xf32>
    %26 = vector.shape_cast %25 : vector<16xf32> to vector<16x1xf32>
    %27 = arith.addf %12, %26 : vector<16x1xf32>
    %28 = arith.extf %16 : vector<16x256xbf16> to vector<16x256xf32>
    %29 = vector.broadcast %21 : vector<1x256xf32> to vector<16x256xf32>
    %30 = arith.mulf %28, %29 : vector<16x256xf32>
    %cst_21 = arith.constant dense<0.000000e+00> : vector<16xf32>
    %31 = vector.multi_reduction <add>, %30, %cst_21 [1] : vector<16x256xf32> to vector<16xf32>
    %32 = vector.shape_cast %31 : vector<16xf32> to vector<16x1xf32>
    %33 = arith.addf %13, %32 : vector<16x1xf32>
    %c256 = arith.constant 256 : index
    %c0_22 = arith.constant 0 : index
    %34 = vector.load %arg6[%c256, %c0_22] : memref<512x512xbf16, #tpu.memory_space<vmem>>, vector<256x512xbf16>
    %35 = vector.extract_strided_slice %4 {offsets = [1, 0], sizes = [16, 256], strides = [1, 1]} : vector<32x256xbf16> to vector<16x256xbf16>
    %36 = vector.extract_strided_slice %9 {offsets = [1, 0], sizes = [16, 256], strides = [1, 1]} : vector<32x256xbf16> to vector<16x256xbf16>
    %cst_23 = arith.constant dense<0.000000e+00> : vector<16x512xf32>
    %37 = tpu.matmul %35, %34, %cst_23 {dimension_numbers = #tpu.dot_dimension_numbers<[1], [0], [0], [1], [0, 0, 1, 1], [], []>} : vector<16x256xbf16>, vector<256x512xbf16>, vector<16x512xf32> -> vector<16x512xf32>
    %38 = arith.addf %18, %37 : vector<16x512xf32>
    %cst_24 = arith.constant dense<0.000000e+00> : vector<16x512xf32>
    %39 = tpu.matmul %36, %34, %cst_24 {dimension_numbers = #tpu.dot_dimension_numbers<[1], [0], [0], [1], [0, 0, 1, 1], [], []>} : vector<16x256xbf16>, vector<256x512xbf16>, vector<16x512xf32> -> vector<16x512xf32>
    %40 = arith.addf %20, %39 : vector<16x512xf32>
    %c1 = arith.constant 1 : index
    %c0_25 = arith.constant 0 : index
    %41 = vector.load %arg7[%c1, %c0_25] : memref<8x256xf32, #tpu.memory_space<vmem>>, vector<1x256xf32>
    %42 = arith.extf %35 : vector<16x256xbf16> to vector<16x256xf32>
    %43 = vector.broadcast %41 : vector<1x256xf32> to vector<16x256xf32>
    %44 = arith.mulf %42, %43 : vector<16x256xf32>
    %cst_26 = arith.constant dense<0.000000e+00> : vector<16xf32>
    %45 = vector.multi_reduction <add>, %44, %cst_26 [1] : vector<16x256xf32> to vector<16xf32>
    %46 = vector.shape_cast %45 : vector<16xf32> to vector<16x1xf32>
    %47 = arith.addf %27, %46 : vector<16x1xf32>
    %48 = arith.extf %36 : vector<16x256xbf16> to vector<16x256xf32>
    %49 = vector.broadcast %41 : vector<1x256xf32> to vector<16x256xf32>
    %50 = arith.mulf %48, %49 : vector<16x256xf32>
    %cst_27 = arith.constant dense<0.000000e+00> : vector<16xf32>
    %51 = vector.multi_reduction <add>, %50, %cst_27 [1] : vector<16x256xf32> to vector<16xf32>
    %52 = vector.shape_cast %51 : vector<16xf32> to vector<16x1xf32>
    %53 = arith.addf %33, %52 : vector<16x1xf32>
    %54 = vector.extract_strided_slice %38 {offsets = [0, 0], sizes = [16, 256], strides = [1, 1]} : vector<16x512xf32> to vector<16x256xf32>
    %55 = vector.extract_strided_slice %38 {offsets = [0, 256], sizes = [16, 256], strides = [1, 1]} : vector<16x512xf32> to vector<16x256xf32>
    %56 = arith.mulf %54, %54 : vector<16x256xf32>
    %57 = arith.mulf %55, %55 : vector<16x256xf32>
    %58 = arith.addf %56, %57 : vector<16x256xf32>
    %59 = math.sqrt %58 : vector<16x256xf32>
    %cst_28 = arith.constant 9.99999993E-9 : f32
    %60 = vector.broadcast %cst_28 : f32 to vector<16x256xf32>
    %61 = arith.maximumf %59, %60 : vector<16x256xf32>
    %62 = vector.extract_strided_slice %40 {offsets = [0, 0], sizes = [16, 256], strides = [1, 1]} : vector<16x512xf32> to vector<16x256xf32>
    %63 = vector.extract_strided_slice %40 {offsets = [0, 256], sizes = [16, 256], strides = [1, 1]} : vector<16x512xf32> to vector<16x256xf32>
    %64 = arith.mulf %62, %62 : vector<16x256xf32>
    %65 = arith.mulf %63, %63 : vector<16x256xf32>
    %66 = arith.addf %64, %65 : vector<16x256xf32>
    %67 = math.sqrt %66 : vector<16x256xf32>
    %cst_29 = arith.constant 9.99999993E-9 : f32
    %68 = vector.broadcast %cst_29 : f32 to vector<16x256xf32>
    %69 = arith.maximumf %67, %68 : vector<16x256xf32>
    %70 = arith.subf %61, %69 : vector<16x256xf32>
    %71 = math.absf %70 : vector<16x256xf32>
    %72 = math.absf %47 : vector<16x1xf32>
    %cst_30 = arith.constant 9.99999993E-9 : f32
    %73 = vector.broadcast %cst_30 : f32 to vector<16x1xf32>
    %74 = arith.maximumf %72, %73 : vector<16x1xf32>
    %75 = math.absf %53 : vector<16x1xf32>
    %cst_31 = arith.constant 9.99999993E-9 : f32
    %76 = vector.broadcast %cst_31 : f32 to vector<16x1xf32>
    %77 = arith.maximumf %75, %76 : vector<16x1xf32>
    %78 = arith.subf %74, %77 : vector<16x1xf32>
    %79 = math.absf %78 : vector<16x1xf32>
    %c16_i32 = arith.constant 16 : i32
    %80 = arith.muli %arg1, %c16_i32 : i32
    %81 = tpu.iota {dimensions = array<i32: 0>} : vector<16x1xi32>
    %82 = vector.broadcast %80 : i32 to vector<16x1xi32>
    %83 = arith.addi %82, %81 : vector<16x1xi32>
    %c9_i32 = arith.constant 9 : i32
    %84 = vector.broadcast %c9_i32 : i32 to vector<16x1xi32>
    %85 = arith.cmpi slt, %83, %84 : vector<16x1xi32>
    %86 = arith.extui %85 : vector<16x1xi1> to vector<16x1xi32>
    %87 = arith.sitofp %86 : vector<16x1xi32> to vector<16x1xf32>
    %88 = vector.broadcast %87 : vector<16x1xf32> to vector<16x256xf32>
    %89 = arith.mulf %71, %88 : vector<16x256xf32>
    %90 = vector.shape_cast %89 : vector<16x256xf32> to vector<1x16x256xf32>
    %cst_32 = arith.constant dense<0.000000e+00> : vector<1xf32>
    %91 = vector.multi_reduction <add>, %90, %cst_32 [1, 2] : vector<1x16x256xf32> to vector<1xf32>
    %92 = vector.shape_cast %91 : vector<1xf32> to vector<1x1x1xf32>
    %93 = vector.extract %92[0, 0, 0] : f32 from vector<1x1x1xf32>
    %94 = arith.mulf %79, %87 : vector<16x1xf32>
    %95 = vector.shape_cast %94 : vector<16x1xf32> to vector<1x16x1xf32>
    %cst_33 = arith.constant dense<0.000000e+00> : vector<1xf32>
    %96 = vector.multi_reduction <add>, %95, %cst_33 [1, 2] : vector<1x16x1xf32> to vector<1xf32>
    %97 = vector.shape_cast %96 : vector<1xf32> to vector<1x1x1xf32>
    %98 = vector.extract %97[0, 0, 0] : f32 from vector<1x1x1xf32>
    %99 = arith.addf %93, %98 : f32
    %100 = vector.broadcast %99 : f32 to vector<1x1x8x128xf32>
    %c0_34 = arith.constant 0 : index
    %c0_35 = arith.constant 0 : index
    %c0_36 = arith.constant 0 : index
    %c0_37 = arith.constant 0 : index
    %101 = vector.load %arg8[%c0_34, %c0_35, %c0_36, %c0_37] : memref<1x1x8x128xf32, #tpu.memory_space<vmem>>, vector<1x1x8x128xf32>
    tpu.vector_store %arg8[%c0_34, %c0_35, %c0_36, %c0_37], %100 {strides = array<i32>} : memref<1x1x8x128xf32, #tpu.memory_space<vmem>>, vector<1x1x8x128xf32>,
    return
  }
  func.func @transform_0(%arg0: i32, %arg1: i32) -> (i32, i32, i32) {
    %c0_i32 = arith.constant 0 : i32
    %c0_i32_0 = arith.constant 0 : i32
    return %arg0, %arg1, %c0_i32 : i32, i32, i32
  }
  func.func @transform_1(%arg0: i32, %arg1: i32) -> (i32, i32, i32) {
    %c1_i32 = arith.constant 1 : i32
    %0 = arith.addi %arg1, %c1_i32 : i32
    %c1_i32_0 = arith.constant 1 : i32
    %1 = arith.muli %0, %c1_i32_0 : i32
    %c0_i32 = arith.constant 0 : i32
    %c0_i32_1 = arith.constant 0 : i32
    return %arg0, %1, %c0_i32 : i32, i32, i32
  }
  func.func @transform_2(%arg0: i32, %arg1: i32) -> (i32, i32, i32) {
    %c0_i32 = arith.constant 0 : i32
    %c0_i32_0 = arith.constant 0 : i32
    return %arg0, %arg1, %c0_i32 : i32, i32, i32
  }
  func.func @transform_3(%arg0: i32, %arg1: i32) -> (i32, i32, i32) {
    %c1_i32 = arith.constant 1 : i32
    %0 = arith.addi %arg1, %c1_i32 : i32
    %c1_i32_0 = arith.constant 1 : i32
    %1 = arith.muli %0, %c1_i32_0 : i32
    %c0_i32 = arith.constant 0 : i32
    %c0_i32_1 = arith.constant 0 : i32
    return %arg0, %1, %c0_i32 : i32, i32, i32
  }
  func.func @transform_4(%arg0: i32, %arg1: i32) -> (i32, i32) {
    %c0_i32 = arith.constant 0 : i32
    %c0_i32_0 = arith.constant 0 : i32
    %c0_i32_1 = arith.constant 0 : i32
    return %c0_i32, %c0_i32_0 : i32, i32
  }
  func.func @transform_5(%arg0: i32, %arg1: i32) -> (i32, i32) {
    %c0_i32 = arith.constant 0 : i32
    %c0_i32_0 = arith.constant 0 : i32
    %c0_i32_1 = arith.constant 0 : i32
    return %c0_i32, %c0_i32_0 : i32, i32
  }
  func.func @transform_6(%arg0: i32, %arg1: i32) -> (i32, i32, i32, i32) {
    %c0_i32 = arith.constant 0 : i32
    %c0_i32_0 = arith.constant 0 : i32
    %c0_i32_1 = arith.constant 0 : i32
    return %arg0, %arg1, %c0_i32, %c0_i32_0 : i32, i32, i32, i32
  }
}

</mosaic_0001>

<bundles_post_ra>
// kernel: _wav_stft_mag_loss_impl.1
= control target key start
LH: loop header
LB: loop body
LE: loop exit
PB: predicated region body
PF: predicated region fallthrough
CT: control target
= control target key end

     0   :  { %s3000_s21 = smov 0   ;;  %s3002_s22 = smov 0   ;;  %s4646_s0 = inlined_call_operand.vmem [shape: bf16[2,32,256], index: 0, kind: input, shape index: {}, may-alias: {0,1}]   ;;  %s4647_s1 = inlined_call_operand.vmem [shape: bf16[2,32,256], index: 1, kind: input, shape index: {}, may-alias: {0,1}]   ;;  %s4648_s2 = inlined_call_operand.vmem [shape: bf16[2,32,256], index: 2, kind: input, shape index: {}, may-alias: {2,3}]   ;;  %s4649_s3 = inlined_call_operand.vmem [shape: bf16[2,32,256], index: 3, kind: input, shape index: {}, may-alias: {2,3}]   ;;  %s4650_s4 = inlined_call_operand.vmem [shape: bf16[512,512], index: 4, kind: input, shape index: {}]   ;;  %s4651_s5 = inlined_call_operand.vmem [shape: f32[8,256], index: 5, kind: input, shape index: {}]   ;;  %s4652_s6 = inlined_call_operand.vmem [shape: f32[2,1,8,128], index: 6, kind: output, shape index: {}]  }
   0x1   :  { %s3004_s23 = smov 0  }
   0x2 LB: > { %s28_s24 = sadd.s32 1, %s2958_s22  ;;  %p2193_p0 = scmp.ge.s32.totalorder %s2962_s23, 1  ;;  %s2962_s23 = sphi %s3004_s23, %s16_s23   ;;  %s2958_s22 = sphi %s3002_s22, %s4882_s22   ;;  %s2954_s21 = sphi %s3000_s21, %s4881_s21  }
   0x3   : > { %p30_p1 = scmp.ge.s32.totalorder %s28_s24, 2  ;;  %p296_p2 = scmp.lt.s32.totalorder %s2962_s23, 3 }
   0x5   : > { %s4884_s24 = smov (%p30_p1, %s28_s24), 0  ;;  %p297_p3 = pnand %p2193_p0, %p296_p2 }
   0x7   : > { %300 = sbr.rel (%p297_p3) target bundleno = 633 (0x279), region = 44 }
   0xc   : > { %v2349_v0 = vld [vmem:[%s4650_s4 + $0x2e0] sm:$0xf]  ;;  %v2859_v1 = vld [vmem:[%s4650_s4 + $0x2ec] sm:$0xf0]  ;;  %v2857_v5 = vld [vmem:[%s4650_s4 + $0x2e4] sm:$0xf] }
   0xd   : > { %v2477_v2 = vld [vmem:[%s4650_s4 + $0x3e0] sm:$0xf]  ;;  %v3029_v3 = vor.u32 %v2859_v1, %v2349_v0  ;;  %v2891_v4 = vld [vmem:[%s4650_s4 + $0x3ec] sm:$0xf0]  ;;  %v2351_v6 = vld [vmem:[%s4650_s4 + $0x2f0] sm:$0xf0] }
   0xe   : > { %v3040_v7 = vor.u32 %v2891_v4, %v2477_v2  ;;  %v3042_v8 = vor.u32 %v2857_v5, %v2351_v6  ;;  %v2889_v9 = vld [vmem:[%s4650_s4 + $0x3e4] sm:$0xf]  ;;  %v2479_v10 = vld [vmem:[%s4650_s4 + $0x3f0] sm:$0xf0]  ;;  %v2333_v11 = vld [vmem:[%s4650_s4 + $0x2c0] sm:$0xf] }
   0xf   : > { %981 = vmatpush.bf16.msra.mxu0 %v3029_v3  ;;  %v3054_v12 = vor.u32 %v2889_v9, %v2479_v10  ;;  %v2855_v13 = vld [vmem:[%s4650_s4 + $0x2cc] sm:$0xf0]  ;;  %v2461_v14 = vld [vmem:[%s4650_s4 + $0x3c0] sm:$0xf]  ;;  %v2853_v18 = vld [vmem:[%s4650_s4 + $0x2c4] sm:$0xf] }
  0x10   : > { %v2887_v15 = vld [vmem:[%s4650_s4 + $0x3cc] sm:$0xf0]  ;;  %995 = vmatpush.bf16.msra.mxu1 %v3040_v7  ;;  %1009 = vmatpush.bf16.msra.mxu2 %v3042_v8  ;;  %v3067_v16 = vor.u32 %v2855_v13, %v2333_v11  ;;  %v2335_v19 = vld [vmem:[%s4650_s4 + $0x2d0] sm:$0xf0]  ;;  %v2885_v20 = vld [vmem:[%s4650_s4 + $0x3c4] sm:$0xf] }
  0x11   : > { %v3069_v17 = vor.u32 %v2887_v15, %v2461_v14  ;;  %1023 = vmatpush.bf16.msra.mxu3 %v3054_v12  ;;  %v3081_v21 = vor.u32 %v2853_v18, %v2335_v19  ;;  %v2463_v22 = vld [vmem:[%s4650_s4 + $0x3d0] sm:$0xf0]  ;;  %v2317_v23 = vld [vmem:[%s4650_s4 + $0x2a0] sm:$0xf]  ;;  %v2851_v24 = vld [vmem:[%s4650_s4 + $0x2ac] sm:$0xf0] }
  0x12   : > { %v3092_v25 = vor.u32 %v2885_v20, %v2463_v22  ;;  %v2445_v26 = vld [vmem:[%s4650_s4 + $0x3a0] sm:$0xf]  ;;  %v2883_v27 = vld [vmem:[%s4650_s4 + $0x3ac] sm:$0xf0]  ;;  %v2849_v28 = vld [vmem:[%s4650_s4 + $0x2a4] sm:$0xf]  ;;  %v3104_v29 = vor.u32 %v2851_v24, %v2317_v23 }
  0x13   : > { %982 = vmatpush.bf16.msra.mxu0 %v3067_v16  ;;  %v2319_v30 = vld [vmem:[%s4650_s4 + $0x2b0] sm:$0xf0]  ;;  %v2881_v31 = vld [vmem:[%s4650_s4 + $0x3a4] sm:$0xf]  ;;  %v3117_v33 = vor.u32 %v2883_v27, %v2445_v26  ;;  %v2301_v35 = vld [vmem:[%s4650_s4 + $0x280] sm:$0xf] }
  0x14   : > { %v2447_v32 = vld [vmem:[%s4650_s4 + $0x3b0] sm:$0xf0]  ;;  %996 = vmatpush.bf16.msra.mxu1 %v3069_v17  ;;  %1010 = vmatpush.bf16.msra.mxu2 %v3081_v21  ;;  %v3119_v34 = vor.u32 %v2849_v28, %v2319_v30  ;;  %v2847_v36 = vld [vmem:[%s4650_s4 + $0x28c] sm:$0xf0]  ;;  %v2429_v37 = vld [vmem:[%s4650_s4 + $0x380] sm:$0xf] }
  0x15   : > { %1024 = vmatpush.bf16.msra.mxu3 %v3092_v25  ;;  %v3131_v38 = vor.u32 %v2881_v31, %v2447_v32  ;;  %v2879_v39 = vld [vmem:[%s4650_s4 + $0x38c] sm:$0xf0]  ;;  %v2845_v40 = vld [vmem:[%s4650_s4 + $0x284] sm:$0xf]  ;;  %v2303_v41 = vld [vmem:[%s4650_s4 + $0x290] sm:$0xf0]  ;;  %v3149_v44 = vor.u32 %v2847_v36, %v2301_v35 }
  0x16   : > { %v2877_v42 = vld [vmem:[%s4650_s4 + $0x384] sm:$0xf]  ;;  %v2431_v43 = vld [vmem:[%s4650_s4 + $0x390] sm:$0xf0]  ;;  %v3153_v45 = vor.u32 %v2879_v39, %v2429_v37  ;;  %v3155_v46 = vor.u32 %v2845_v40, %v2303_v41  ;;  %v2285_v47 = vld [vmem:[%s4650_s4 + $0x260] sm:$0xf] }
  0x17   : > { %983 = vmatpush.bf16.msra.mxu0 %v3104_v29  ;;  %v2843_v48 = vld [vmem:[%s4650_s4 + $0x26c] sm:$0xf0]  ;;  %v2413_v49 = vld [vmem:[%s4650_s4 + $0x360] sm:$0xf]  ;;  %v3167_v50 = vor.u32 %v2877_v42, %v2431_v43  ;;  %v2841_v52 = vld [vmem:[%s4650_s4 + $0x264] sm:$0xf] }
  0x18   : > { %997 = vmatpush.bf16.msra.mxu1 %v3117_v33  ;;  %1011 = vmatpush.bf16.msra.mxu2 %v3119_v34  ;;  %v2875_v51 = vld [vmem:[%s4650_s4 + $0x36c] sm:$0xf0]  ;;  %v2287_v53 = vld [vmem:[%s4650_s4 + $0x270] sm:$0xf0]  ;;  %v2873_v54 = vld [vmem:[%s4650_s4 + $0x364] sm:$0xf]  ;;  %v3185_v56 = vor.u32 %v2843_v48, %v2285_v47 }
  0x19   : > { %1025 = vmatpush.bf16.msra.mxu3 %v3131_v38  ;;  %v2415_v55 = vld [vmem:[%s4650_s4 + $0x370] sm:$0xf0]  ;;  %v3189_v57 = vor.u32 %v2875_v51, %v2413_v49  ;;  %v3191_v58 = vor.u32 %v2841_v52, %v2287_v53  ;;  %v2269_v59 = vld [vmem:[%s4650_s4 + $0x240] sm:$0xf]  ;;  %v2839_v60 = vld [vmem:[%s4650_s4 + $0x24c] sm:$0xf0] }
  0x1a   : > { %v2397_v61 = vld [vmem:[%s4650_s4 + $0x340] sm:$0xf]  ;;  %v3203_v62 = vor.u32 %v2873_v54, %v2415_v55  ;;  %v2871_v63 = vld [vmem:[%s4650_s4 + $0x34c] sm:$0xf0]  ;;  %v2837_v0 = vld [vmem:[%s4650_s4 + $0x244] sm:$0xf]  ;;  %v3221_v5 = vor.u32 %v2839_v60, %v2269_v59 }
  0x1b   : > { %984 = vmatpush.bf16.msra.mxu0 %v3149_v44  ;;  %v2271_v1 = vld [vmem:[%s4650_s4 + $0x250] sm:$0xf0]  ;;  %v2869_v2 = vld [vmem:[%s4650_s4 + $0x344] sm:$0xf]  ;;  %v3225_v6 = vor.u32 %v2871_v63, %v2397_v61  ;;  %v2253_v10 = vld [vmem:[%s4650_s4 + $0x220] sm:$0xf] }
  0x1c   : > { %998 = vmatpush.bf16.msra.mxu1 %v3153_v45  ;;  %1012 = vmatpush.bf16.msra.mxu2 %v3155_v46  ;;  %v2399_v4 = vld [vmem:[%s4650_s4 + $0x350] sm:$0xf0]  ;;  %v3227_v9 = vor.u32 %v2837_v0, %v2271_v1  ;;  %v2835_v11 = vld [vmem:[%s4650_s4 + $0x22c] sm:$0xf0]  ;;  %v2381_v13 = vld [vmem:[%s4650_s4 + $0x320] sm:$0xf] }
  0x1d   : > { %1026 = vmatpush.bf16.msra.mxu3 %v3167_v50  ;;  %v3239_v14 = vor.u32 %v2869_v2, %v2399_v4  ;;  %v2867_v15 = vld [vmem:[%s4650_s4 + $0x32c] sm:$0xf0]  ;;  %v2833_v18 = vld [vmem:[%s4650_s4 + $0x224] sm:$0xf]  ;;  %v2255_v19 = vld [vmem:[%s4650_s4 + $0x230] sm:$0xf0]  ;;  %v3257_v23 = vor.u32 %v2835_v11, %v2253_v10 }
  0x1e   : > { %v2865_v20 = vld [vmem:[%s4650_s4 + $0x324] sm:$0xf]  ;;  %v2383_v22 = vld [vmem:[%s4650_s4 + $0x330] sm:$0xf0]  ;;  %v2237_v24 = vld [vmem:[%s4650_s4 + $0x200] sm:$0xf]  ;;  %v3267_v27 = vor.u32 %v2867_v15, %v2381_v13  ;;  %v3269_v28 = vor.u32 %v2833_v18, %v2255_v19 }
  0x1f   : > { %985 = vmatpush.bf16.msra.mxu0 %v3185_v56  ;;  %v2831_v26 = vld [vmem:[%s4650_s4 + $0x20c] sm:$0xf0]  ;;  %v2365_v30 = vld [vmem:[%s4650_s4 + $0x300] sm:$0xf]  ;;  %v2829_v32 = vld [vmem:[%s4650_s4 + $0x204] sm:$0xf]  ;;  %v3281_v35 = vor.u32 %v2865_v20, %v2383_v22 }
  0x20   : > { %999 = vmatpush.bf16.msra.mxu1 %v3189_v57  ;;  %1013 = vmatpush.bf16.msra.mxu2 %v3191_v58  ;;  %v2863_v31 = vld [vmem:[%s4650_s4 + $0x30c] sm:$0xf0]  ;;  %v2239_v36 = vld [vmem:[%s4650_s4 + $0x210] sm:$0xf0]  ;;  %v2861_v37 = vld [vmem:[%s4650_s4 + $0x304] sm:$0xf]  ;;  %v3302_v43 = vor.u32 %v2831_v26, %v2237_v24 }
  0x21   : > { %1027 = vmatpush.bf16.msra.mxu3 %v3203_v62  ;;  %v2367_v39 = vld [vmem:[%s4650_s4 + $0x310] sm:$0xf0]  ;;  %v2357_v40 = vld [vmem:[%s4650_s4 + $0x2e8] sm:$0xf]  ;;  %v2860_v41 = vld [vmem:[%s4650_s4 + $0x2f4] sm:$0xf0]  ;;  %v3315_v51 = vor.u32 %v2863_v31, %v2365_v30  ;;  %v3317_v52 = vor.u32 %v2829_v32, %v2239_v36 }
  0x22   : > { %v2485_v42 = vld [vmem:[%s4650_s4 + $0x3e8] sm:$0xf]  ;;  %v2892_v47 = vld [vmem:[%s4650_s4 + $0x3f4] sm:$0xf0]  ;;  %v2858_v48 = vld [vmem:[%s4650_s4 + $0x2ec] sm:$0xf]  ;;  %v3326_v55 = vor.u32 %v2861_v37, %v2367_v39  ;;  %v3328_v59 = vor.u32 %v2860_v41, %v2357_v40 }
  0x23   : > { %986 = vmatpush.bf16.msra.mxu0 %v3221_v5  ;;  %v2359_v49 = vld [vmem:[%s4650_s4 + $0x2f8] sm:$0xf0]  ;;  %v2890_v53 = vld [vmem:[%s4650_s4 + $0x3ec] sm:$0xf]  ;;  %v3330_v60 = vor.u32 %v2892_v47, %v2485_v42  ;;  %v2341_v63 = vld [vmem:[%s4650_s4 + $0x2c8] sm:$0xf] }
  0x24   : > { %1000 = vmatpush.bf16.msra.mxu1 %v3225_v6  ;;  %1014 = vmatpush.bf16.msra.mxu2 %v3227_v9  ;;  %v2487_v54 = vld [vmem:[%s4650_s4 + $0x3f8] sm:$0xf0]  ;;  %v3332_v61 = vor.u32 %v2858_v48, %v2359_v49  ;;  %v2856_v0 = vld [vmem:[%s4650_s4 + $0x2d4] sm:$0xf0]  ;;  %v2469_v1 = vld [vmem:[%s4650_s4 + $0x3c8] sm:$0xf] }
  0x25   : > { %1028 = vmatpush.bf16.msra.mxu3 %v3239_v14  ;;  %v3344_v2 = vor.u32 %v2890_v53, %v2487_v54  ;;  %v2888_v4 = vld [vmem:[%s4650_s4 + $0x3d4] sm:$0xf0]  ;;  %v2854_v10 = vld [vmem:[%s4650_s4 + $0x2cc] sm:$0xf]  ;;  %v2343_v11 = vld [vmem:[%s4650_s4 + $0x2d8] sm:$0xf0]  ;;  %v3365_v18 = vor.u32 %v2856_v0, %v2341_v63 }
  0x26   : > { %v2886_v13 = vld [vmem:[%s4650_s4 + $0x3cc] sm:$0xf]  ;;  %v2471_v15 = vld [vmem:[%s4650_s4 + $0x3d8] sm:$0xf0]  ;;  %v3369_v19 = vor.u32 %v2888_v4, %v2469_v1  ;;  %v3371_v20 = vor.u32 %v2854_v10, %v2343_v11  ;;  %v2325_v22 = vld [vmem:[%s4650_s4 + $0x2a8] sm:$0xf] }
  0x27   : > { %987 = vmatpush.bf16.msra.mxu0 %v3257_v23  ;;  %v2852_v24 = vld [vmem:[%s4650_s4 + $0x2b4] sm:$0xf0]  ;;  %v2453_v26 = vld [vmem:[%s4650_s4 + $0x3a8] sm:$0xf]  ;;  %v3383_v30 = vor.u32 %v2886_v13, %v2471_v15  ;;  %v2850_v32 = vld [vmem:[%s4650_s4 + $0x2ac] sm:$0xf] }
  0x28   : > { %1001 = vmatpush.bf16.msra.mxu1 %v3267_v27  ;;  %1015 = vmatpush.bf16.msra.mxu2 %v3269_v28  ;;  %4729 = vst [vmem:[#allocation2_spill] sm:$0xff] %v3369_v19  ;;  %v2884_v31 = vld [vmem:[%s4650_s4 + $0x3b4] sm:$0xf0]  ;;  %v2327_v36 = vld [vmem:[%s4650_s4 + $0x2b8] sm:$0xf0]  ;;  %v3401_v40 = vor.u32 %v2852_v24, %v2325_v22  ;;  %p366_p4 = scmp.lt.s32.totalorder %s2954_s21, 1 }
  0x29   : > { %1029 = vmatpush.bf16.msra.mxu3 %v3281_v35  ;;  %4730 = vst [vmem:[#allocation3_spill] sm:$0xff] %v3371_v20  ;;  %v2882_v37 = vld [vmem:[%s4650_s4 + $0x3ac] sm:$0xf]  ;;  %v2455_v39 = vld [vmem:[%s4650_s4 + $0x3b8] sm:$0xf0]  ;;  %v3412_v47 = vor.u32 %v2884_v31, %v2453_v26  ;;  %v3414_v48 = vor.u32 %v2850_v32, %v2327_v36  ;;  %vm1790_vm1 = vcmask 1047553  }
  0x2a   : > { %4731 = vst [vmem:[#allocation4_spill] sm:$0xff] %v3383_v30  ;;  %v2309_v41 = vld [vmem:[%s4650_s4 + $0x288] sm:$0xf]  ;;  %v2848_v42 = vld [vmem:[%s4650_s4 + $0x294] sm:$0xf0]  ;;  %v3426_v63 = vor.u32 %v2882_v37, %v2455_v39  ;;  %s4886_s21 = smov (!%p366_p4, %s2954_s21), 1 }
  0x2b   : > { %988 = vmatpush.bf16.msra.mxu0 %v3302_v43  ;;  %4732 = vst [vmem:[#allocation5_spill] sm:$0xff] %v3401_v40  ;;  %v2437_v49 = vld [vmem:[%s4650_s4 + $0x388] sm:$0xf]  ;;  %v2880_v53 = vld [vmem:[%s4650_s4 + $0x394] sm:$0xf0]  ;;  %v3447_v13 = vor.u32 %v2848_v42, %v2309_v41  ;;  %s3462_s29 = sshll.u32 %s4886_s21, 5 }
  0x2c   : > { %1002 = vmatpush.bf16.msra.mxu1 %v3315_v51  ;;  %1016 = vmatpush.bf16.msra.mxu2 %v3317_v52  ;;  %4733 = vst [vmem:[#allocation6_spill] sm:$0xff] %v3412_v47  ;;  %v2846_v54 = vld [vmem:[%s4650_s4 + $0x28c] sm:$0xf]  ;;  %v2311_v0 = vld [vmem:[%s4650_s4 + $0x298] sm:$0xf0]  ;;  %v3466_v31 = vor.u32 %v2880_v53, %v2437_v49  ;;  %s374_s12 = scalar_lea.vmem %s4646_s0, %s3462_s29  ;;  %s2753_s13 = sadd.s32 16, %s3462_s29 }
  0x2d   : > { %1030 = vmatpush.bf16.msra.mxu3 %v3326_v55  ;;  %4734 = vst [vmem:[#allocation7_spill] sm:$0xff] %v3414_v48  ;;  %v2878_v1 = vld [vmem:[%s4650_s4 + $0x38c] sm:$0xf]  ;;  %v2439_v4 = vld [vmem:[%s4650_s4 + $0x398] sm:$0xf0]  ;;  %v3468_v32 = vor.u32 %v2846_v54, %v2311_v0  ;;  %s386_s16 = scalar_lea.vmem %s4647_s1, %s2753_s13  ;;  %s398_s17 = scalar_lea.vmem %s4648_s2, %s3462_s29  ;;  %vm1799_vm2 = vcmask 1040384  }
  0x2e   : > { %4735 = vst [vmem:[#allocation8_spill] sm:$0xff] %v3426_v63  ;;  %v2293_v10 = vld [vmem:[%s4650_s4 + $0x268] sm:$0xf]  ;;  %v2844_v11 = vld [vmem:[%s4650_s4 + $0x274] sm:$0xf0]  ;;  %v3482_v39 = vor.u32 %v2878_v1, %v2439_v4  ;;  %s410_s20 = scalar_lea.vmem %s4649_s3, %s2753_s13  ;;  %vm1808_vm3 = vcmask 1046528  }
  0x2f   : > { %1037 = vmatpush.bf16.msrb.mxu0 %v3328_v59  ;;  %4736 = vst [vmem:[#allocation9_spill] sm:$0xff] %v3447_v13  ;;  %v2421_v15 = vld [vmem:[%s4650_s4 + $0x368] sm:$0xf]  ;;  %v2876_v22 = vld [vmem:[%s4650_s4 + $0x374] sm:$0xf0]  ;;  %v3495_v1 = vor.u32 %v2844_v11, %v2293_v10  ;;  %vm2030_vm5 = vcmask 7168  }
  0x30   : > { %1051 = vmatpush.bf16.msrb.mxu1 %v3330_v60  ;;  %1065 = vmatpush.bf16.msrb.mxu2 %v3332_v61  ;;  %v2842_v24 = vld [vmem:[%s4650_s4 + $0x26c] sm:$0xf]  ;;  %v2295_v26 = vld [vmem:[%s4650_s4 + $0x278] sm:$0xf0]  ;;  %4737 = vst [vmem:[#allocation10_spill] sm:$0xff] %v3466_v31  ;;  %v3512_v10 = vor.u32 %v2876_v22, %v2421_v15  ;;  %s2202_s27 = sshll.u32 %s4886_s21, 3 }
  0x31   : > { %1079 = vmatpush.bf16.msrb.mxu3 %v3344_v2  ;;  %4738 = vst [vmem:[#allocation11_spill] sm:$0xff] %v3468_v32  ;;  %v2874_v36 = vld [vmem:[%s4650_s4 + $0x36c] sm:$0xf]  ;;  %v2423_v37 = vld [vmem:[%s4650_s4 + $0x378] sm:$0xf0]  ;;  %v3514_v11 = vor.u32 %v2842_v24, %v2295_v26  ;;  %s419_s9 = scalar_lea.vmem %s4652_s6, %s2202_s27 }
  0x32   : > { %4739 = vst [vmem:[#allocation12_spill] sm:$0xff] %v3482_v39  ;;  %v2757_v41 = vld [vmem:[%s374_s12 + $0x4] sm:$0xf]  ;;  %v2205_v42 = vld [vmem:[%s374_s12] sm:$0xf] }
  0x33   : > { %1038 = vmatpush.bf16.msrb.mxu0 %v3365_v18  ;;  %v2207_v49 = vld [vmem:[%s374_s12 + $0x8] sm:$0xf0]  ;;  %v2277_v53 = vld [vmem:[%s4650_s4 + $0x248] sm:$0xf]  ;;  %v2213_v0 = vld [vmem:[%s386_s16] sm:$0xf] }
  0x34   : > { %1052 = vmatpush.bf16.msrb.mxu1 %v3369_v19  ;;  %1066 = vmatpush.bf16.msrb.mxu2 %v3371_v20  ;;  %v2758_v54 = vld [vmem:[%s374_s12 + $0x4] sm:$0xf0]  ;;  %4740 = vst [vmem:[#allocation13_spill] sm:$0xff] %v3495_v1  ;;  %v2840_v4 = vld [vmem:[%s4650_s4 + $0x254] sm:$0xf0] }
  0x35   : > { %1080 = vmatpush.bf16.msrb.mxu3 %v3383_v30  ;;  %v3506_v30 = vor.u32 %v2758_v54, %v2205_v42  ;;  %4742 = vst [vmem:[#allocation15_spill] sm:$0xff] %v3514_v11  ;;  %v2215_v20 = vld [vmem:[%s386_s16 + $0x8] sm:$0xf0]  ;;  %v3520_v42 = vor.u32 %v2874_v36, %v2423_v37  ;;  %v2407_v26 = vld [vmem:[%s4650_s4 + $0x358] sm:$0xf0] }
  0x36   : > { %v2870_v24 = vld [vmem:[%s4650_s4 + $0x34c] sm:$0xf]  ;;  %vm634_vm0 = vsmask.f32 7424 }
  0x37   : > { %1039 = vmatpush.bf16.msrb.mxu0 %v3401_v40  ;;  %v2872_v40 = vld [vmem:[%s4650_s4 + $0x354] sm:$0xf0]  ;;  %4743 = vst [vmem:[#allocation16_spill] sm:$0xff] %v3520_v42  ;;  %v636_v54 = vshrl.u32 %v3506_v30, 16  ;;  %v638_v15 = vshll.u32 %v3506_v30, 16 }
  0x38   : > { %1053 = vmatpush.bf16.msrb.mxu1 %v3412_v47  ;;  %1067 = vmatpush.bf16.msrb.mxu2 %v3414_v48  ;;  %v2760_v48 = vld [vmem:[%s386_s16 + $0x4] sm:$0xf0]  ;;  %v3492_v47 = vor.u32 %v2757_v41, %v2207_v49  ;;  %v2838_v49 = vld [vmem:[%s4650_s4 + $0x24c] sm:$0xf] }
  0x39   : > { %1081 = vmatpush.bf16.msrb.mxu3 %v3426_v63  ;;  %v2405_v63 = vld [vmem:[%s4650_s4 + $0x348] sm:$0xf]  ;;  %v3508_v41 = vor.u32 %v2760_v48, %v2213_v0  ;;  %v2279_v48 = vld [vmem:[%s4650_s4 + $0x258] sm:$0xf0] }
  0x3a   : > { %v648_v37 = vshrl.u32 %v3492_v47, 16  ;;  %v650_v0 = vshll.u32 %v3492_v47, 16 }
  0x3b   : > { %1040 = vmatpush.bf16.msrb.mxu0 %v3447_v13  ;;  %4741 = vst [vmem:[#allocation14_spill] sm:$0xff] %v3508_v41  ;;  %v2759_v13 = vld [vmem:[%s386_s16 + $0x4] sm:$0xf]  ;;  %v643_v22 = vshll.u32 %v3508_v41, 16  ;;  %v640_v41 = vrot.slane %v638_v15, 1  ;;  %v3558_v15 = vor.u32 %v2870_v24, %v2407_v26 }
  0x3c   : > { %1054 = vmatpush.bf16.msrb.mxu1 %v3466_v31  ;;  %1068 = vmatpush.bf16.msrb.mxu2 %v3468_v32  ;;  %v3534_v36 = vor.u32 %v2759_v13, %v2215_v20  ;;  %v2261_v31 = vld [vmem:[%s4650_s4 + $0x228] sm:$0xf]  ;;  %v3546_v20 = vor.u32 %v2872_v40, %v2405_v63  ;;  %v3548_v13 = vor.u32 %v2838_v49, %v2279_v48  ;;  %v652_v19 = vrot.slane %v650_v0, 1  ;;  %v2868_v40 = vld [vmem:[%s4650_s4 + $0x334] sm:$0xf0] }
  0x3d   : > { %1082 = vmatpush.bf16.msrb.mxu3 %v3482_v39  ;;  %v3539_v39 = vor.u32 %v2840_v4, %v2277_v53  ;;  %v645_v32 = vrot.slane %v643_v22, 1  ;;  %v2836_v53 = vld [vmem:[%s4650_s4 + $0x234] sm:$0xf0]  ;;  %v2389_v4 = vld [vmem:[%s4650_s4 + $0x328] sm:$0xf]  ;;  %4748 = vst [vmem:[#allocation21_spill] sm:$0xff] %v3558_v15  ;;  %v641_v22 = vor.u32 %v640_v41, %v636_v54 }
  0x3e   : > { %4744 = vst [vmem:[#allocation17_spill] sm:$0xff] %v3534_v36  ;;  %v2834_v63 = vld [vmem:[%s4650_s4 + $0x22c] sm:$0xf]  ;;  %v2263_v49 = vld [vmem:[%s4650_s4 + $0x238] sm:$0xf0]  ;;  %v653_v48 = vor.u32 %v652_v19, %v648_v37  ;;  %v3579_v26 = vor.u32 %v2836_v53, %v2261_v31 }
  0x3f   : > { %1041 = vmatpush.bf16.msrb.mxu0 %v3495_v1  ;;  %4745 = vst [vmem:[#allocation18_spill] sm:$0xff] %v3539_v39  ;;  %v655_v1 = vshll.u32 %v3534_v36, 16  ;;  %v2866_v24 = vld [vmem:[%s4650_s4 + $0x32c] sm:$0xf]  ;;  %v2391_v41 = vld [vmem:[%s4650_s4 + $0x338] sm:$0xf0]  ;;  %v3577_v54 = vsel %vm634_vm0, %v641_v22, %v645_v32  ;;  %v3592_v36 = vor.u32 %v2868_v40, %v2389_v4  ;;  %v3594_v32 = vor.u32 %v2834_v63, %v2263_v49 }
  0x40   : > { %1055 = vmatpush.bf16.msrb.mxu1 %v3512_v10  ;;  %1069 = vmatpush.bf16.msrb.mxu2 %v3514_v11  ;;  %4746 = vst [vmem:[#allocation19_spill] sm:$0xff] %v3546_v20  ;;  %v2245_v19 = vld [vmem:[%s4650_s4 + $0x208] sm:$0xf]  ;;  %v2864_v53 = vld [vmem:[%s4650_s4 + $0x314] sm:$0xf0]  ;;  %v3607_v4 = vor.u32 %v2866_v24, %v2391_v41 }
  0x41   : > { %4747 = vst [vmem:[#allocation20_spill] sm:$0xff] %v3548_v13  ;;  %1083 = vmatpush.bf16.msrb.mxu3 %v3520_v42  ;;  %v657_v0 = vrot.slane %v655_v1, 1  ;;  %v2832_v1 = vld [vmem:[%s4650_s4 + $0x214] sm:$0xf0]  ;;  %v2373_v31 = vld [vmem:[%s4650_s4 + $0x308] sm:$0xf]  ;;  %1017 = vmatmul.bf16.vlgmr.msra.gmra.mxu2 %v3577_v54 }
  0x42   : > { %4749 = vst [vmem:[#allocation22_spill] sm:$0xff] %v3579_v26  ;;  %v2830_v22 = vld [vmem:[%s4650_s4 + $0x20c] sm:$0xf]  ;;  %v2247_v40 = vld [vmem:[%s4650_s4 + $0x218] sm:$0xf0]  ;;  %989 = vmatmul.bf16.vlgmr.msra.gmra.mxu0 %v3577_v54  ;;  %v3631_v41 = vor.u32 %v2832_v1, %v2245_v19 }
  0x43   : > { %1042 = vmatpush.bf16.msrb.mxu0 %v3539_v39  ;;  %v3590_v37 = vsel %vm634_vm0, %v653_v48, %v657_v0  ;;  %4750 = vst [vmem:[#allocation23_spill] sm:$0xff] %v3592_v36  ;;  %v2862_v63 = vld [vmem:[%s4650_s4 + $0x30c] sm:$0xf]  ;;  %v2375_v49 = vld [vmem:[%s4650_s4 + $0x318] sm:$0xf0]  ;;  %v3646_v19 = vor.u32 %v2830_v22, %v2247_v40 }
  0x44   : > { %1056 = vmatpush.bf16.msrb.mxu1 %v3546_v20  ;;  %1070 = vmatpush.bf16.msrb.mxu2 %v3548_v13  ;;  %v2605_v48 = vld [vmem:[%s4650_s4 + $0xe0] sm:$0xf]  ;;  %v2795_v0 = vld [vmem:[%s4650_s4 + $0xec] sm:$0xf0]  ;;  %4751 = vst [vmem:[#allocation24_spill] sm:$0xff] %v3631_v41  ;;  %v3655_v42 = vor.u32 %v2862_v63, %v2375_v49 }
  0x45   : > { %1084 = vmatpush.bf16.msrb.mxu3 %v3558_v15  ;;  %v2733_v24 = vld [vmem:[%s4650_s4 + $0x1e0] sm:$0xf]  ;;  %1003 = vmatmul.bf16.vlgmr.msra.gmra.mxu1 %v3590_v37  ;;  %v2827_v15 = vld [vmem:[%s4650_s4 + $0x1ec] sm:$0xf0]  ;;  %v2793_v13 = vld [vmem:[%s4650_s4 + $0xe4] sm:$0xf]  ;;  %v3657_v11 = vor.u32 %v2795_v0, %v2605_v48 }
  0x46   : > { %1031 = vmatmul.bf16.vlgmr.msra.gmra.mxu3 %v3590_v37  ;;  %v2607_v20 = vld [vmem:[%s4650_s4 + $0xf0] sm:$0xf0]  ;;  %4753 = vst [vmem:[#allocation26_spill] sm:$0xff] %v3646_v19  ;;  %v2825_v1 = vld [vmem:[%s4650_s4 + $0x1e4] sm:$0xf] }
  0x47   : > { %1043 = vmatpush.bf16.msrb.mxu0 %v3579_v26  ;;  %v3644_v26 = vor.u32 %v2864_v53, %v2373_v31  ;;  %v2735_v39 = vld [vmem:[%s4650_s4 + $0x1f0] sm:$0xf0]  ;;  %4754 = vst [vmem:[#allocation27_spill] sm:$0xff] %v3655_v42  ;;  %v3661_v31 = vor.u32 %v2793_v13, %v2607_v20  ;;  %v2589_v53 = vld [vmem:[%s4650_s4 + $0xc0] sm:$0xf] }
  0x48   : > { %1057 = vmatpush.bf16.msrb.mxu1 %v3592_v36  ;;  %1071 = vmatpush.bf16.msrb.mxu2 %v3594_v32  ;;  %4755 = vst [vmem:[#allocation28_spill] sm:$0xff] %v3657_v11  ;;  %v3659_v36 = vor.u32 %v2827_v15, %v2733_v24  ;;  %v2791_v22 = vld [vmem:[%s4650_s4 + $0xcc] sm:$0xf0]  ;;  %v2717_v40 = vld [vmem:[%s4650_s4 + $0x1c0] sm:$0xf]  ;;  %v3673_v63 = vor.u32 %v2825_v1, %v2735_v39 }
  0x49   : > { %4752 = vst [vmem:[#allocation25_spill] sm:$0xff] %v3644_v26  ;;  %1085 = vmatpush.bf16.msrb.mxu3 %v3607_v4  ;;  %v2823_v20 = vld [vmem:[%s4650_s4 + $0x1cc] sm:$0xf0]  ;;  %v2789_v13 = vld [vmem:[%s4650_s4 + $0xc4] sm:$0xf]  ;;  %v3694_v48 = vor.u32 %v2791_v22, %v2589_v53 }
  0x4a   : > { %4756 = vst [vmem:[#allocation29_spill] sm:$0xff] %v3659_v36  ;;  %v2591_v15 = vld [vmem:[%s4650_s4 + $0xd0] sm:$0xf0]  ;;  %v2821_v39 = vld [vmem:[%s4650_s4 + $0x1c4] sm:$0xf]  ;;  %v3698_v0 = vor.u32 %v2823_v20, %v2717_v40 }
  0x4b   : > { %4757 = vst [vmem:[#allocation30_spill] sm:$0xff] %v3661_v31  ;;  %1044 = vmatpush.bf16.msrb.mxu0 %v3631_v41  ;;  %v2719_v49 = vld [vmem:[%s4650_s4 + $0x1d0] sm:$0xf0]  ;;  %v3700_v24 = vor.u32 %v2789_v13, %v2591_v15  ;;  %v2573_v1 = vld [vmem:[%s4650_s4 + $0xa0] sm:$0xf] }
  0x4c   : > { %4758 = vst [vmem:[#allocation31_spill] sm:$0xff] %v3673_v63  ;;  %1058 = vmatpush.bf16.msrb.mxu1 %v3644_v26  ;;  %1072 = vmatpush.bf16.msrb.mxu2 %v3646_v19  ;;  %v2701_v53 = vld [vmem:[%s4650_s4 + $0x1a0] sm:$0xf]  ;;  %v3712_v22 = vor.u32 %v2821_v39, %v2719_v49  ;;  %v2819_v40 = vld [vmem:[%s4650_s4 + $0x1ac] sm:$0xf0] }
  0x4d   : > { %1086 = vmatpush.bf16.msrb.mxu3 %v3655_v42  ;;  %4759 = vst [vmem:[#allocation32_spill] sm:$0xff] %v3694_v48  ;;  %v2787_v42 = vld [vmem:[%s4650_s4 + $0xac] sm:$0xf0]  ;;  %v2785_v20 = vld [vmem:[%s4650_s4 + $0xa4] sm:$0xf] }
  0x4e   : > { %4760 = vst [vmem:[#allocation33_spill] sm:$0xff] %v3698_v0  ;;  %v2575_v13 = vld [vmem:[%s4650_s4 + $0xb0] sm:$0xf0]  ;;  %v2817_v15 = vld [vmem:[%s4650_s4 + $0x1a4] sm:$0xf]  ;;  %v3730_v49 = vor.u32 %v2787_v42, %v2573_v1 }
  0x4f   : > { %1413 = vmatpush.bf16.msra.mxu0 %v3657_v11  ;;  %4761 = vst [vmem:[#allocation34_spill] sm:$0xff] %v3700_v24  ;;  %v2703_v39 = vld [vmem:[%s4650_s4 + $0x1b0] sm:$0xf0]  ;;  %v2783_v11 = vld [vmem:[%s4650_s4 + $0x8c] sm:$0xf0] }
  0x50   : > { %1427 = vmatpush.bf16.msra.mxu1 %v3659_v36  ;;  %1441 = vmatpush.bf16.msra.mxu2 %v3661_v31  ;;  %4762 = vst [vmem:[#allocation35_spill] sm:$0xff] %v3712_v22  ;;  %v3736_v31 = vor.u32 %v2785_v20, %v2575_v13  ;;  %v2557_v36 = vld [vmem:[%s4650_s4 + $0x80] sm:$0xf]  ;;  %v3748_v1 = vor.u32 %v2817_v15, %v2703_v39  ;;  %v2559_v20 = vld [vmem:[%s4650_s4 + $0x90] sm:$0xf0] }
  0x51   : > { %1455 = vmatpush.bf16.msra.mxu3 %v3673_v63  ;;  %4763 = vst [vmem:[#allocation36_spill] sm:$0xff] %v3730_v49  ;;  %v3734_v63 = vor.u32 %v2819_v40, %v2701_v53  ;;  %v2685_v42 = vld [vmem:[%s4650_s4 + $0x180] sm:$0xf]  ;;  %v2815_v53 = vld [vmem:[%s4650_s4 + $0x18c] sm:$0xf0]  ;;  %v3766_v39 = vor.u32 %v2783_v11, %v2557_v36  ;;  %1073 = vmatmul.bf16.vlgmr.msrb.gmra.mxu2 %v3577_v54 }
  0x52   : > { %4765 = vst [vmem:[#allocation38_spill] sm:$0xff] %v3736_v31  ;;  %v2781_v40 = vld [vmem:[%s4650_s4 + $0x84] sm:$0xf]  ;;  %v2687_v15 = vld [vmem:[%s4650_s4 + $0x190] sm:$0xf0]  ;;  %1045 = vmatmul.bf16.vlgmr.msrb.gmra.mxu0 %v3577_v54 }
  0x53   : > { %1414 = vmatpush.bf16.msra.mxu0 %v3694_v48  ;;  %4764 = vst [vmem:[#allocation37_spill] sm:$0xff] %v3734_v63  ;;  %v2813_v13 = vld [vmem:[%s4650_s4 + $0x184] sm:$0xf]  ;;  %v2669_v11 = vld [vmem:[%s4650_s4 + $0x160] sm:$0xf] }
  0x54   : > { %1428 = vmatpush.bf16.msra.mxu1 %v3698_v0  ;;  %1442 = vmatpush.bf16.msra.mxu2 %v3700_v24  ;;  %4766 = vst [vmem:[#allocation39_spill] sm:$0xff] %v3748_v1  ;;  %v3773_v24 = vor.u32 %v2781_v40, %v2559_v20  ;;  %v2541_v0 = vld [vmem:[%s4650_s4 + $0x60] sm:$0xf]  ;;  %v3785_v36 = vor.u32 %v2813_v13, %v2687_v15  ;;  %v2543_v40 = vld [vmem:[%s4650_s4 + $0x70] sm:$0xf0] }
  0x55   : > { %1456 = vmatpush.bf16.msra.mxu3 %v3712_v22  ;;  %4767 = vst [vmem:[#allocation40_spill] sm:$0xff] %v3766_v39  ;;  %v3771_v22 = vor.u32 %v2815_v53, %v2685_v42  ;;  %v2811_v42 = vld [vmem:[%s4650_s4 + $0x16c] sm:$0xf0]  ;;  %v2777_v53 = vld [vmem:[%s4650_s4 + $0x64] sm:$0xf]  ;;  %1059 = vmatmul.bf16.vlgmr.msrb.gmra.mxu1 %v3590_v37 }
  0x56   : > { %4769 = vst [vmem:[#allocation42_spill] sm:$0xff] %v3773_v24  ;;  %v2809_v20 = vld [vmem:[%s4650_s4 + $0x164] sm:$0xf]  ;;  %v2671_v54 = vld [vmem:[%s4650_s4 + $0x170] sm:$0xf0]  ;;  %1087 = vmatmul.bf16.vlgmr.msrb.gmra.mxu3 %v3590_v37  ;;  %v3810_v15 = vor.u32 %v2811_v42, %v2669_v11 }
  0x57   : > { %1415 = vmatpush.bf16.msra.mxu0 %v3730_v49  ;;  %4768 = vst [vmem:[#allocation41_spill] sm:$0xff] %v3771_v22  ;;  %v2779_v49 = vld [vmem:[%s4650_s4 + $0x6c] sm:$0xf0]  ;;  %v2773_v42 = vld [vmem:[%s4650_s4 + $0x44] sm:$0xf] }
  0x58   : > { %1429 = vmatpush.bf16.msra.mxu1 %v3734_v63  ;;  %1443 = vmatpush.bf16.msra.mxu2 %v3736_v31  ;;  %4770 = vst [vmem:[#allocation43_spill] sm:$0xff] %v3785_v36  ;;  %v3806_v13 = vor.u32 %v2779_v49, %v2541_v0  ;;  %v2525_v31 = vld [vmem:[%s4650_s4 + $0x40] sm:$0xf]  ;;  %v2775_v37 = vld [vmem:[%s4650_s4 + $0x4c] sm:$0xf0]  ;;  %v3824_v49 = vor.u32 %v2809_v20, %v2671_v54 }
  0x59   : > { %1457 = vmatpush.bf16.msra.mxu3 %v3748_v1  ;;  %4772 = vst [vmem:[#allocation45_spill] sm:$0xff] %v3810_v15  ;;  %v3812_v1 = vor.u32 %v2777_v53, %v2543_v40  ;;  %v2653_v0 = vld [vmem:[%s4650_s4 + $0x140] sm:$0xf]  ;;  %v2807_v11 = vld [vmem:[%s4650_s4 + $0x14c] sm:$0xf0]  ;;  %v3842_v54 = vor.u32 %v2775_v37, %v2525_v31 }
  0x5a   : > { %4771 = vst [vmem:[#allocation44_spill] sm:$0xff] %v3806_v13  ;;  %v2527_v53 = vld [vmem:[%s4650_s4 + $0x50] sm:$0xf0]  ;;  %v2805_v40 = vld [vmem:[%s4650_s4 + $0x144] sm:$0xf] }
  0x5b   : > { %1416 = vmatpush.bf16.msra.mxu0 %v3766_v39  ;;  %4773 = vst [vmem:[#allocation46_spill] sm:$0xff] %v3812_v1  ;;  %v2655_v20 = vld [vmem:[%s4650_s4 + $0x150] sm:$0xf0]  ;;  %v2771_v39 = vld [vmem:[%s4650_s4 + $0x2c] sm:$0xf0] }
  0x5c   : > { %1430 = vmatpush.bf16.msra.mxu1 %v3771_v22  ;;  %1444 = vmatpush.bf16.msra.mxu2 %v3773_v24  ;;  %4774 = vst [vmem:[#allocation47_spill] sm:$0xff] %v3824_v49  ;;  %v3848_v24 = vor.u32 %v2773_v42, %v2527_v53  ;;  %v2509_v22 = vld [vmem:[%s4650_s4 + $0x20] sm:$0xf]  ;;  %v3860_v37 = vor.u32 %v2805_v40, %v2655_v20  ;;  %v2511_v42 = vld [vmem:[%s4650_s4 + $0x30] sm:$0xf0] }
  0x5d   : > { %1458 = vmatpush.bf16.msra.mxu3 %v3785_v36  ;;  %4775 = vst [vmem:[#allocation48_spill] sm:$0xff] %v3842_v54  ;;  %v3846_v36 = vor.u32 %v2807_v11, %v2653_v0  ;;  %v2637_v31 = vld [vmem:[%s4650_s4 + $0x120] sm:$0xf]  ;;  %v2803_v0 = vld [vmem:[%s4650_s4 + $0x12c] sm:$0xf0]  ;;  %v3878_v20 = vor.u32 %v2771_v39, %v2509_v22 }
  0x5e   : > { %4777 = vst [vmem:[#allocation50_spill] sm:$0xff] %v3848_v24  ;;  %v2769_v11 = vld [vmem:[%s4650_s4 + $0x24] sm:$0xf]  ;;  %v2639_v40 = vld [vmem:[%s4650_s4 + $0x130] sm:$0xf0] }
  0x5f   : > { %1417 = vmatpush.bf16.msra.mxu0 %v3806_v13  ;;  %4776 = vst [vmem:[#allocation49_spill] sm:$0xff] %v3846_v36  ;;  %v2801_v53 = vld [vmem:[%s4650_s4 + $0x124] sm:$0xf]  ;;  %v3890_v13 = vor.u32 %v2769_v11, %v2511_v42  ;;  %v2621_v22 = vld [vmem:[%s4650_s4 + $0x100] sm:$0xf] }
  0x60   : > { %1431 = vmatpush.bf16.msra.mxu1 %v3810_v15  ;;  %1445 = vmatpush.bf16.msra.mxu2 %v3812_v1  ;;  %4778 = vst [vmem:[#allocation51_spill] sm:$0xff] %v3860_v37  ;;  %v2767_v1 = vld [vmem:[%s4650_s4 + $0xc] sm:$0xf0]  ;;  %v3888_v15 = vor.u32 %v2803_v0, %v2637_v31  ;;  %v2495_v31 = vld [vmem:[%s4650_s4 + $0x10] sm:$0xf0] }
  0x61   : > { %1459 = vmatpush.bf16.msra.mxu3 %v3824_v49  ;;  %4779 = vst [vmem:[#allocation52_spill] sm:$0xff] %v3878_v20  ;;  %v2493_v49 = vld [vmem:[%s4650_s4] sm:$0xf]  ;;  %v2799_v39 = vld [vmem:[%s4650_s4 + $0x10c] sm:$0xf0] }
  0x62   : > { %4780 = vst [vmem:[#allocation53_spill] sm:$0xff] %v3888_v15  ;;  %v2797_v0 = vld [vmem:[%s4650_s4 + $0x104] sm:$0xf]  ;;  %v2623_v11 = vld [vmem:[%s4650_s4 + $0x110] sm:$0xf0]  ;;  %v3936_v19 = vor.u32 %v2799_v39, %v2621_v22 }
  0x63   : > { %1418 = vmatpush.bf16.msra.mxu0 %v3842_v54  ;;  %v2765_v54 = vld [vmem:[%s4650_s4 + $0x4] sm:$0xf]  ;;  %v2613_v42 = vld [vmem:[%s4650_s4 + $0xe8] sm:$0xf]  ;;  %v2794_v63 = vld [vmem:[%s4650_s4 + $0xec] sm:$0xf]  ;;  %v3947_v26 = vor.u32 %v2797_v0, %v2623_v11 }
  0x64   : > { %1432 = vmatpush.bf16.msra.mxu1 %v3846_v36  ;;  %1446 = vmatpush.bf16.msra.mxu2 %v3848_v24  ;;  %v3902_v36 = vor.u32 %v2801_v53, %v2639_v40  ;;  %v2796_v53 = vld [vmem:[%s4650_s4 + $0xf4] sm:$0xf0]  ;;  %v2741_v40 = vld [vmem:[%s4650_s4 + $0x1e8] sm:$0xf]  ;;  %v2615_v48 = vld [vmem:[%s4650_s4 + $0xf8] sm:$0xf0] }
  0x65   : > { %1460 = vmatpush.bf16.msra.mxu3 %v3860_v37  ;;  %v3923_v37 = vor.u32 %v2767_v1, %v2493_v49  ;;  %v2828_v24 = vld [vmem:[%s4650_s4 + $0x1f4] sm:$0xf0]  ;;  %v3938_v1 = vor.u32 %v2765_v54, %v2495_v31  ;;  %v2826_v49 = vld [vmem:[%s4650_s4 + $0x1ec] sm:$0xf]  ;;  %4781 = vst [vmem:[#allocation54_spill] sm:$0xff] %v3947_v26  ;;  %v3949_v41 = vor.u32 %v2796_v53, %v2613_v42 }
  0x66   : > { %v3953_v22 = vor.u32 %v2794_v63, %v2615_v48  ;;  %v2597_v54 = vld [vmem:[%s4650_s4 + $0xc8] sm:$0xf]  ;;  %v2792_v39 = vld [vmem:[%s4650_s4 + $0xd4] sm:$0xf0]  ;;  %v2790_v48 = vld [vmem:[%s4650_s4 + $0xcc] sm:$0xf] }
  0x67   : > { %1419 = vmatpush.bf16.msra.mxu0 %v3878_v20  ;;  %v2743_v20 = vld [vmem:[%s4650_s4 + $0x1f8] sm:$0xf0]  ;;  %4782 = vst [vmem:[#allocation55_spill] sm:$0xff] %v3949_v41  ;;  %v2725_v31 = vld [vmem:[%s4650_s4 + $0x1c8] sm:$0xf]  ;;  %v3986_v42 = vor.u32 %v2792_v39, %v2597_v54 }
  0x68   : > { %1433 = vmatpush.bf16.msra.mxu1 %v3888_v15  ;;  %1447 = vmatpush.bf16.msra.mxu2 %v3890_v13  ;;  %v3951_v15 = vor.u32 %v2828_v24, %v2741_v40  ;;  %4784 = vst [vmem:[#allocation57_spill] sm:$0xff] %v3953_v22  ;;  %v3965_v0 = vor.u32 %v2826_v49, %v2743_v20  ;;  %v2824_v63 = vld [vmem:[%s4650_s4 + $0x1d4] sm:$0xf0]  ;;  %v2599_v24 = vld [vmem:[%s4650_s4 + $0xd8] sm:$0xf0] }
  0x69   : > { %1461 = vmatpush.bf16.msra.mxu3 %v3902_v36  ;;  %v2822_v20 = vld [vmem:[%s4650_s4 + $0x1cc] sm:$0xf]  ;;  %v2727_v11 = vld [vmem:[%s4650_s4 + $0x1d8] sm:$0xf0]  ;;  %4786 = vst [vmem:[#allocation59_spill] sm:$0xff] %v3986_v42  ;;  %v3990_v53 = vor.u32 %v2824_v63, %v2725_v31  ;;  %v3992_v40 = vor.u32 %v2790_v48, %v2599_v24 }
  0x6a   : > { %4783 = vst [vmem:[#allocation56_spill] sm:$0xff] %v3951_v15  ;;  %v2581_v49 = vld [vmem:[%s4650_s4 + $0xa8] sm:$0xf]  ;;  %v4005_v39 = vor.u32 %v2822_v20, %v2727_v11  ;;  %v2820_v31 = vld [vmem:[%s4650_s4 + $0x1b4] sm:$0xf0] }
  0x6b   : > { %1420 = vmatpush.bf16.msra.mxu0 %v3923_v37  ;;  %4785 = vst [vmem:[#allocation58_spill] sm:$0xff] %v3965_v0  ;;  %v2709_v54 = vld [vmem:[%s4650_s4 + $0x1a8] sm:$0xf]  ;;  %v2786_v63 = vld [vmem:[%s4650_s4 + $0xac] sm:$0xf] }
  0x6c   : > { %1434 = vmatpush.bf16.msra.mxu1 %v3936_v19  ;;  %1448 = vmatpush.bf16.msra.mxu2 %v3938_v1  ;;  %4787 = vst [vmem:[#allocation60_spill] sm:$0xff] %v3990_v53  ;;  %v2583_v48 = vld [vmem:[%s4650_s4 + $0xb8] sm:$0xf0]  ;;  %v2818_v24 = vld [vmem:[%s4650_s4 + $0x1ac] sm:$0xf] }
  0x6d   : > { %1462 = vmatpush.bf16.msra.mxu3 %v3947_v26  ;;  %4788 = vst [vmem:[#allocation61_spill] sm:$0xff] %v3992_v40  ;;  %v2788_v26 = vld [vmem:[%s4650_s4 + $0xb4] sm:$0xf0]  ;;  %v2711_v20 = vld [vmem:[%s4650_s4 + $0x1b8] sm:$0xf0] }
  0x6e   : > { %1421 = vmatmul.bf16.vlgmr.msra.gmra.mxu0 %v3506_v30  ;;  %4789 = vst [vmem:[#allocation62_spill] sm:$0xff] %v4005_v39  ;;  %v4026_v11 = vor.u32 %v2788_v26, %v2581_v49  ;;  %v2693_v26 = vld [vmem:[%s4650_s4 + $0x188] sm:$0xf]  ;;  %v4044_v49 = vor.u32 %v2818_v24, %v2711_v20  ;;  %v2695_v24 = vld [vmem:[%s4650_s4 + $0x198] sm:$0xf0] }
  0x6f   : > { %1469 = vmatpush.bf16.msrb.mxu0 %v3949_v41  ;;  %1449 = vmatmul.bf16.vlgmr.msra.gmra.mxu2 %v3506_v30  ;;  %v2784_v41 = vld [vmem:[%s4650_s4 + $0x94] sm:$0xf0] }
  0x70   : > { %1483 = vmatpush.bf16.msrb.mxu1 %v3951_v15  ;;  %1497 = vmatpush.bf16.msrb.mxu2 %v3953_v22  ;;  %4790 = vst [vmem:[#allocation63_spill] sm:$0xff] %v4026_v11  ;;  %v4032_v22 = vor.u32 %v2786_v63, %v2583_v48  ;;  %v2565_v15 = vld [vmem:[%s4650_s4 + $0x88] sm:$0xf]  ;;  %v2567_v63 = vld [vmem:[%s4650_s4 + $0x98] sm:$0xf0] }
  0x71   : > { %1511 = vmatpush.bf16.msrb.mxu3 %v3965_v0  ;;  %1435 = vmatmul.bf16.vlgmr.msra.gmra.mxu1 %v3492_v47  ;;  %v4030_v0 = vor.u32 %v2820_v31, %v2709_v54  ;;  %4793 = vst [vmem:[#allocation66_spill] sm:$0xff] %v4044_v49  ;;  %v2816_v54 = vld [vmem:[%s4650_s4 + $0x194] sm:$0xf0]  ;;  %v2782_v31 = vld [vmem:[%s4650_s4 + $0x8c] sm:$0xf]  ;;  %v4062_v20 = vor.u32 %v2784_v41, %v2565_v15 }
  0x72   : > { %1463 = vmatmul.bf16.vlgmr.msra.gmra.mxu3 %v3492_v47  ;;  %4792 = vst [vmem:[#allocation65_spill] sm:$0xff] %v4032_v22  ;;  %v2814_v48 = vld [vmem:[%s4650_s4 + $0x18c] sm:$0xf]  ;;  %v2677_v41 = vld [vmem:[%s4650_s4 + $0x168] sm:$0xf] }
  0x73   : > { %1470 = vmatpush.bf16.msrb.mxu0 %v3986_v42  ;;  %4791 = vst [vmem:[#allocation64_spill] sm:$0xff] %v4030_v0  ;;  %v2780_v42 = vld [vmem:[%s4650_s4 + $0x74] sm:$0xf0]  ;;  %v4080_v15 = vor.u32 %v2814_v48, %v2695_v24  ;;  %v2679_v48 = vld [vmem:[%s4650_s4 + $0x178] sm:$0xf0] }
  0x74   : > { %1484 = vmatpush.bf16.msrb.mxu1 %v3990_v53  ;;  %1498 = vmatpush.bf16.msrb.mxu2 %v3992_v40  ;;  %4794 = vst [vmem:[#allocation67_spill] sm:$0xff] %v4062_v20  ;;  %v4068_v40 = vor.u32 %v2782_v31, %v2567_v63  ;;  %v2549_v53 = vld [vmem:[%s4650_s4 + $0x68] sm:$0xf]  ;;  %v2551_v31 = vld [vmem:[%s4650_s4 + $0x78] sm:$0xf0] }
  0x75   : > { %1512 = vmatpush.bf16.msrb.mxu3 %v4005_v39  ;;  %v4066_v39 = vor.u32 %v2816_v54, %v2693_v26  ;;  %4797 = vst [vmem:[#allocation70_spill] sm:$0xff] %v4080_v15  ;;  %v2812_v26 = vld [vmem:[%s4650_s4 + $0x174] sm:$0xf0]  ;;  %v2778_v54 = vld [vmem:[%s4650_s4 + $0x6c] sm:$0xf]  ;;  %v4098_v24 = vor.u32 %v2780_v42, %v2549_v53 }
  0x76   : > { %4796 = vst [vmem:[#allocation69_spill] sm:$0xff] %v4068_v40  ;;  %v2810_v63 = vld [vmem:[%s4650_s4 + $0x16c] sm:$0xf]  ;;  %v2661_v42 = vld [vmem:[%s4650_s4 + $0x148] sm:$0xf] }
  0x77   : > { %1471 = vmatpush.bf16.msrb.mxu0 %v4026_v11  ;;  %4795 = vst [vmem:[#allocation68_spill] sm:$0xff] %v4066_v39  ;;  %v2776_v11 = vld [vmem:[%s4650_s4 + $0x54] sm:$0xf0]  ;;  %v4116_v53 = vor.u32 %v2810_v63, %v2679_v48  ;;  %v2663_v63 = vld [vmem:[%s4650_s4 + $0x158] sm:$0xf0] }
  0x78   : > { %1485 = vmatpush.bf16.msrb.mxu1 %v4030_v0  ;;  %1499 = vmatpush.bf16.msrb.mxu2 %v4032_v22  ;;  %4798 = vst [vmem:[#allocation71_spill] sm:$0xff] %v4098_v24  ;;  %v4104_v22 = vor.u32 %v2778_v54, %v2551_v31  ;;  %v2533_v0 = vld [vmem:[%s4650_s4 + $0x48] sm:$0xf]  ;;  %v2535_v54 = vld [vmem:[%s4650_s4 + $0x58] sm:$0xf0] }
  0x79   : > { %1513 = vmatpush.bf16.msrb.mxu3 %v4044_v49  ;;  %v4102_v49 = vor.u32 %v2812_v26, %v2677_v41  ;;  %4801 = vst [vmem:[#allocation74_spill] sm:$0xff] %v4116_v53  ;;  %v2808_v41 = vld [vmem:[%s4650_s4 + $0x154] sm:$0xf0]  ;;  %v2774_v26 = vld [vmem:[%s4650_s4 + $0x4c] sm:$0xf]  ;;  %v4134_v48 = vor.u32 %v2776_v11, %v2533_v0 }
  0x7a   : > { %4800 = vst [vmem:[#allocation73_spill] sm:$0xff] %v4104_v22  ;;  %v2806_v31 = vld [vmem:[%s4650_s4 + $0x14c] sm:$0xf]  ;;  %v2645_v0 = vld [vmem:[%s4650_s4 + $0x128] sm:$0xf] }
  0x7b   : > { %1472 = vmatpush.bf16.msrb.mxu0 %v4062_v20  ;;  %4799 = vst [vmem:[#allocation72_spill] sm:$0xff] %v4102_v49  ;;  %v2772_v20 = vld [vmem:[%s4650_s4 + $0x34] sm:$0xf0]  ;;  %v4152_v11 = vor.u32 %v2806_v31, %v2663_v63  ;;  %v2647_v31 = vld [vmem:[%s4650_s4 + $0x138] sm:$0xf0] }
  0x7c   : > { %1486 = vmatpush.bf16.msrb.mxu1 %v4066_v39  ;;  %1500 = vmatpush.bf16.msrb.mxu2 %v4068_v40  ;;  %v4140_v40 = vor.u32 %v2774_v26, %v2535_v54  ;;  %v2517_v39 = vld [vmem:[%s4650_s4 + $0x28] sm:$0xf]  ;;  %v2519_v26 = vld [vmem:[%s4650_s4 + $0x38] sm:$0xf0]  ;;  %v2802_v54 = vld [vmem:[%s4650_s4 + $0x12c] sm:$0xf] }
  0x7d   : > { %1514 = vmatpush.bf16.msrb.mxu3 %v4080_v15  ;;  %v4138_v15 = vor.u32 %v2808_v41, %v2661_v42  ;;  %4804 = vst [vmem:[#allocation77_spill] sm:$0xff] %v4152_v11  ;;  %v2804_v42 = vld [vmem:[%s4650_s4 + $0x134] sm:$0xf0]  ;;  %v2770_v41 = vld [vmem:[%s4650_s4 + $0x2c] sm:$0xf]  ;;  %v4170_v63 = vor.u32 %v2772_v20, %v2517_v39  ;;  %v4188_v20 = vor.u32 %v2802_v54, %v2647_v31 }
  0x7e   : > { %4803 = vst [vmem:[#allocation76_spill] sm:$0xff] %v4140_v40  ;;  %v2629_v39 = vld [vmem:[%s4650_s4 + $0x108] sm:$0xf]  ;;  %v2631_v54 = vld [vmem:[%s4650_s4 + $0x118] sm:$0xf0] }
  0x7f   : > { %1473 = vmatpush.bf16.msrb.mxu0 %v4098_v24  ;;  %4802 = vst [vmem:[#allocation75_spill] sm:$0xff] %v4138_v15  ;;  %v2768_v24 = vld [vmem:[%s4650_s4 + $0x14] sm:$0xf0] }
  0x80   : > { %1487 = vmatpush.bf16.msrb.mxu1 %v4102_v49  ;;  %1501 = vmatpush.bf16.msrb.mxu2 %v4104_v22  ;;  %v4176_v22 = vor.u32 %v2770_v41, %v2519_v26  ;;  %v2501_v49 = vld [vmem:[%s4650_s4 + $0x8] sm:$0xf]  ;;  %v2503_v41 = vld [vmem:[%s4650_s4 + $0x18] sm:$0xf0]  ;;  %v2798_v26 = vld [vmem:[%s4650_s4 + $0x10c] sm:$0xf] }
  0x81   : > { %1515 = vmatpush.bf16.msrb.mxu3 %v4116_v53  ;;  %v4174_v53 = vor.u32 %v2804_v42, %v2645_v0  ;;  %v2800_v0 = vld [vmem:[%s4650_s4 + $0x114] sm:$0xf0]  ;;  %v2766_v42 = vld [vmem:[%s4650_s4 + $0xc] sm:$0xf]  ;;  %v4206_v31 = vor.u32 %v2768_v24, %v2501_v49 }
  0x82   : > { %v4817_v24 = vld [vmem:[#allocation15_spill] sm:$0xff] }
  0x83   : > { %1474 = vmatpush.bf16.msrb.mxu0 %v4134_v48 }
  0x84   : > { %1488 = vmatpush.bf16.msrb.mxu1 %v4138_v15  ;;  %1502 = vmatpush.bf16.msrb.mxu2 %v4140_v40  ;;  %v4212_v40 = vor.u32 %v2766_v42, %v2503_v41  ;;  %v4215_v15 = vor.u32 %v2798_v26, %v2631_v54  ;;  %v4820_v42 = vld [vmem:[#allocation19_spill] sm:$0xff]  ;;  %v4821_v41 = vld [vmem:[#allocation20_spill] sm:$0xff]  ;;  %v4822_v26 = vld [vmem:[#allocation21_spill] sm:$0xff] }
  0x85   : > { %1516 = vmatpush.bf16.msrb.mxu3 %v4152_v11  ;;  %v4210_v11 = vor.u32 %v2800_v0, %v2629_v39  ;;  %v4818_v39 = vld [vmem:[#allocation16_spill] sm:$0xff]  ;;  %v4819_v0 = vld [vmem:[#allocation18_spill] sm:$0xff] }
  0x86   : > { %v4823_v54 = vld [vmem:[#allocation22_spill] sm:$0xff] }
  0x87   : > { %1475 = vmatpush.bf16.msrb.mxu0 %v4170_v63 }
  0x88   : > { %1489 = vmatpush.bf16.msrb.mxu1 %v4174_v53  ;;  %1503 = vmatpush.bf16.msrb.mxu2 %v4176_v22 }
  0x89   : > { %1517 = vmatpush.bf16.msrb.mxu3 %v4188_v20 }
  0x8b   : > { %1476 = vmatpush.bf16.msrb.mxu0 %v4206_v31 }
  0x8c   : > { %1490 = vmatpush.bf16.msrb.mxu1 %v4210_v11  ;;  %1504 = vmatpush.bf16.msrb.mxu2 %v4212_v40 }
  0x8d   : > { %1518 = vmatpush.bf16.msrb.mxu3 %v4215_v15 }
  0x8e   : > { %1477 = vmatmul.bf16.vlgmr.msrb.gmra.mxu0 %v3506_v30 }
  0x8f   : > { %1551 = vmatpush.bf16.msra.mxu0 %v3029_v3  ;;  %1505 = vmatmul.bf16.vlgmr.msrb.gmra.mxu2 %v3506_v30  ;;  %v2221_v3 = vld [vmem:[%s398_s17] sm:$0xf] }
  0x90   : > { %1565 = vmatpush.bf16.msra.mxu1 %v3040_v7  ;;  %1579 = vmatpush.bf16.msra.mxu2 %v3042_v8  ;;  %v2762_v7 = vld [vmem:[%s398_s17 + $0x4] sm:$0xf0]  ;;  %v2761_v8 = vld [vmem:[%s398_s17 + $0x4] sm:$0xf] }
  0x91   : > { %1593 = vmatpush.bf16.msra.mxu3 %v3054_v12  ;;  %1491 = vmatmul.bf16.vlgmr.msrb.gmra.mxu1 %v3492_v47  ;;  %v2223_v12 = vld [vmem:[%s398_s17 + $0x8] sm:$0xf0] }
  0x92   : > { %1519 = vmatmul.bf16.vlgmr.msrb.gmra.mxu3 %v3492_v47 }
  0x93   : > { %1552 = vmatpush.bf16.msra.mxu0 %v3067_v16  ;;  %v4247_v16 = vor.u32 %v2762_v7, %v2221_v3  ;;  %v4824_v3 = vld [vmem:[#allocation23_spill] sm:$0xff] }
  0x94   : > { %1566 = vmatpush.bf16.msra.mxu1 %v3069_v17  ;;  %1580 = vmatpush.bf16.msra.mxu2 %v3081_v21  ;;  %v4251_v17 = vor.u32 %v2761_v8, %v2223_v12  ;;  %v2229_v21 = vld [vmem:[%s410_s20] sm:$0xf]  ;;  %v4826_v8 = vld [vmem:[#allocation25_spill] sm:$0xff] }
  0x95   : > { %1594 = vmatpush.bf16.msra.mxu3 %v3092_v25  ;;  %v2764_v25 = vld [vmem:[%s410_s20 + $0x4] sm:$0xf0]  ;;  %v4827_v12 = vld [vmem:[#allocation26_spill] sm:$0xff] }
  0x97   : > { %1553 = vmatpush.bf16.msra.mxu0 %v3104_v29  ;;  %v2763_v29 = vld [vmem:[%s410_s20 + $0x4] sm:$0xf] }
  0x98   : > { %1567 = vmatpush.bf16.msra.mxu1 %v3117_v33  ;;  %1581 = vmatpush.bf16.msra.mxu2 %v3119_v34  ;;  %v2231_v33 = vld [vmem:[%s410_s20 + $0x8] sm:$0xf0]  ;;  %v4257_v34 = vor.u32 %v2764_v25, %v2229_v21 }
  0x99   : > { %1595 = vmatpush.bf16.msra.mxu3 %v3131_v38  ;;  %v1528_v38 = vshll.u32 %v4247_v16, 16  ;;  %v4828_v25 = vld [vmem:[#allocation27_spill] sm:$0xff] }
  0x9b   : > { %1554 = vmatpush.bf16.msra.mxu0 %v3149_v44  ;;  %v4261_v44 = vor.u32 %v2763_v29, %v2231_v33  ;;  %v4829_v29 = vld [vmem:[#allocation28_spill] sm:$0xff] }
  0x9c   : > { %1568 = vmatpush.bf16.msra.mxu1 %v3153_v45  ;;  %1582 = vmatpush.bf16.msra.mxu2 %v3155_v46  ;;  %v1540_v45 = vshll.u32 %v4251_v17, 16  ;;  %v1526_v46 = vshrl.u32 %v4247_v16, 16 }
  0x9d   : > { %1596 = vmatpush.bf16.msra.mxu3 %v3167_v50  ;;  %v1530_v50 = vrot.slane %v1528_v38, 1  ;;  %v4830_v38 = vld [vmem:[#allocation29_spill] sm:$0xff] }
  0x9f   : > { %1555 = vmatpush.bf16.msra.mxu0 %v3185_v56  ;;  %v1533_v56 = vshll.u32 %v4257_v34, 16 }
  0xa0   : > { %1569 = vmatpush.bf16.msra.mxu1 %v3189_v57  ;;  %1583 = vmatpush.bf16.msra.mxu2 %v3191_v58  ;;  %v1538_v57 = vshrl.u32 %v4251_v17, 16  ;;  %v1542_v58 = vrot.slane %v1540_v45, 1  ;;  %v4831_v45 = vld [vmem:[#allocation30_spill] sm:$0xff] }
  0xa1   : > { %1597 = vmatpush.bf16.msra.mxu3 %v3203_v62  ;;  %v1545_v62 = vshll.u32 %v4261_v44, 16 }
  0xa3   : > { %1556 = vmatpush.bf16.msra.mxu0 %v3221_v5  ;;  %v1531_v5 = vor.u32 %v1530_v50, %v1526_v46  ;;  %v1547_v49 = vrot.slane %v1545_v62, 1  ;;  %v4833_v46 = vld [vmem:[#allocation32_spill] sm:$0xff]  ;;  %v4836_v62 = vld [vmem:[#allocation35_spill] sm:$0xff] }
  0xa4   : > { %1570 = vmatpush.bf16.msra.mxu1 %v3225_v6  ;;  %1584 = vmatpush.bf16.msra.mxu2 %v3227_v9  ;;  %v1535_v6 = vrot.slane %v1533_v56, 1  ;;  %v1543_v9 = vor.u32 %v1542_v58, %v1538_v57  ;;  %v4834_v56 = vld [vmem:[#allocation33_spill] sm:$0xff]  ;;  %v4835_v57 = vld [vmem:[#allocation34_spill] sm:$0xff] }
  0xa5   : > { %1598 = vmatpush.bf16.msra.mxu3 %v3239_v14 }
  0xa6   : > { %v1536_v14 = vsel %vm634_vm0, %v1531_v5, %v1535_v6 }
  0xa7   : > { %1557 = vmatpush.bf16.msra.mxu0 %v3257_v23  ;;  %v1548_v23 = vsel %vm634_vm0, %v1543_v9, %v1547_v49  ;;  %v4837_v9 = vld [vmem:[#allocation36_spill] sm:$0xff] }
  0xa8   : > { %1571 = vmatpush.bf16.msra.mxu1 %v3267_v27  ;;  %1585 = vmatpush.bf16.msra.mxu2 %v3269_v28  ;;  %v4805_v27 = vld [vmem:[#allocation2_spill] sm:$0xff]  ;;  %v4806_v28 = vld [vmem:[#allocation3_spill] sm:$0xff] }
  0xa9   : > { %1599 = vmatpush.bf16.msra.mxu3 %v3281_v35  ;;  %v4807_v35 = vld [vmem:[#allocation4_spill] sm:$0xff] }
  0xab   : > { %1558 = vmatpush.bf16.msra.mxu0 %v3302_v43  ;;  %v4808_v43 = vld [vmem:[#allocation5_spill] sm:$0xff] }
  0xac   : > { %1572 = vmatpush.bf16.msra.mxu1 %v3315_v51  ;;  %1586 = vmatpush.bf16.msra.mxu2 %v3317_v52  ;;  %v4809_v51 = vld [vmem:[#allocation6_spill] sm:$0xff]  ;;  %v4810_v52 = vld [vmem:[#allocation7_spill] sm:$0xff] }
  0xad   : > { %1600 = vmatpush.bf16.msra.mxu3 %v3326_v55  ;;  %v4811_v55 = vld [vmem:[#allocation8_spill] sm:$0xff] }
  0xae   : > { %1559 = vmatmul.bf16.vlgmr.msra.gmra.mxu0 %v1536_v14 }
  0xaf   : > { %1607 = vmatpush.bf16.msrb.mxu0 %v3328_v59  ;;  %1587 = vmatmul.bf16.vlgmr.msra.gmra.mxu2 %v1536_v14  ;;  %v4812_v59 = vld [vmem:[#allocation9_spill] sm:$0xff] }
  0xb0   : > { %1621 = vmatpush.bf16.msrb.mxu1 %v3330_v60  ;;  %1635 = vmatpush.bf16.msrb.mxu2 %v3332_v61  ;;  %v4813_v60 = vld [vmem:[#allocation10_spill] sm:$0xff]  ;;  %v4814_v61 = vld [vmem:[#allocation11_spill] sm:$0xff] }
  0xb1   : > { %1649 = vmatpush.bf16.msrb.mxu3 %v3344_v2  ;;  %1573 = vmatmul.bf16.vlgmr.msra.gmra.mxu1 %v1548_v23  ;;  %v4815_v2 = vld [vmem:[#allocation12_spill] sm:$0xff] }
  0xb2   : > { %1601 = vmatmul.bf16.vlgmr.msra.gmra.mxu3 %v1548_v23 }
  0xb3   : > { %1608 = vmatpush.bf16.msrb.mxu0 %v3365_v18  ;;  %v4816_v18 = vld [vmem:[#allocation13_spill] sm:$0xff] }
  0xb4   : > { %1622 = vmatpush.bf16.msrb.mxu1 %v4805_v27  ;;  %1636 = vmatpush.bf16.msrb.mxu2 %v4806_v28  ;;  %v4839_v27 = vld [vmem:[#allocation38_spill] sm:$0xff]  ;;  %v4840_v28 = vld [vmem:[#allocation39_spill] sm:$0xff] }
  0xb5   : > { %1650 = vmatpush.bf16.msrb.mxu3 %v4807_v35  ;;  %v4841_v35 = vld [vmem:[#allocation40_spill] sm:$0xff] }
  0xb7   : > { %1609 = vmatpush.bf16.msrb.mxu0 %v4808_v43 }
  0xb8   : > { %1623 = vmatpush.bf16.msrb.mxu1 %v4809_v51  ;;  %1637 = vmatpush.bf16.msrb.mxu2 %v4810_v52  ;;  %v4842_v51 = vld [vmem:[#allocation41_spill] sm:$0xff]  ;;  %v4843_v52 = vld [vmem:[#allocation42_spill] sm:$0xff] }
  0xb9   : > { %1651 = vmatpush.bf16.msrb.mxu3 %v4811_v55 }
  0xbb   : > { %1610 = vmatpush.bf16.msrb.mxu0 %v4812_v59  ;;  %v4844_v59 = vld [vmem:[#allocation43_spill] sm:$0xff] }
  0xbc   : > { %1624 = vmatpush.bf16.msrb.mxu1 %v4813_v60  ;;  %1638 = vmatpush.bf16.msrb.mxu2 %v4814_v61  ;;  %v4845_v61 = vld [vmem:[#allocation44_spill] sm:$0xff] }
  0xbd   : > { %1652 = vmatpush.bf16.msrb.mxu3 %v4815_v2 }
  0xbf   : > { %1611 = vmatpush.bf16.msrb.mxu0 %v4816_v18  ;;  %v990_v7 = vpop.f32.mrf.mxu0  ;;  %v4846_v18 = vld [vmem:[#allocation45_spill] sm:$0xff] }
  0xc0   : > { %1625 = vmatpush.bf16.msrb.mxu1 %v3512_v10  ;;  %1639 = vmatpush.bf16.msrb.mxu2 %v4817_v24  ;;  %v4825_v10 = vld [vmem:[#allocation24_spill] sm:$0xff]  ;;  %v4847_v24 = vld [vmem:[#allocation46_spill] sm:$0xff] }
  0xc1   : > { %1653 = vmatpush.bf16.msrb.mxu3 %v4818_v39 }
  0xc2   : > { %v1004_v21 = vpop.f32.mrf.mxu1 }
  0xc3   : > { %1612 = vmatpush.bf16.msrb.mxu0 %v4819_v0  ;;  %v4315_v33 = vadd.f32 %v1004_v21, %v990_v7  ;;  %v4848_v0 = vld [vmem:[#allocation47_spill] sm:$0xff] }
  0xc4   : > { %1626 = vmatpush.bf16.msrb.mxu1 %v4820_v42  ;;  %1640 = vmatpush.bf16.msrb.mxu2 %v4821_v41  ;;  %v4849_v42 = vld [vmem:[#allocation48_spill] sm:$0xff] }
  0xc5   : > { %1654 = vmatpush.bf16.msrb.mxu3 %v4822_v26  ;;  %v4850_v26 = vld [vmem:[#allocation49_spill] sm:$0xff] }
  0xc7   : > { %1613 = vmatpush.bf16.msrb.mxu0 %v4823_v54  ;;  %v992_v5 = vpop.f32.mrf.mxu0  ;;  %v4851_v54 = vld [vmem:[#allocation50_spill] sm:$0xff] }
  0xc8   : > { %1627 = vmatpush.bf16.msrb.mxu1 %v4824_v3  ;;  %1641 = vmatpush.bf16.msrb.mxu2 %v3594_v32  ;;  %v4832_v32 = vld [vmem:[#allocation31_spill] sm:$0xff] }
  0xc9   : > { %1655 = vmatpush.bf16.msrb.mxu3 %v3607_v4  ;;  %v1018_v4 = vpop.f32.mrf.mxu2  ;;  %v1032_v50 = vpop.f32.mrf.mxu3  ;;  %v4852_v3 = vld [vmem:[#allocation51_spill] sm:$0xff] }
  0xca   : > { %v4323_v58 = vadd.f32 %v1032_v50, %v1018_v4  ;;  %v1006_v6 = vpop.f32.mrf.mxu1  ;;  %v4854_v4 = vld [vmem:[#allocation53_spill] sm:$0xff] }
  0xcb   : > { %1614 = vmatpush.bf16.msrb.mxu0 %v4825_v10  ;;  %v4327_v49 = vadd.f32 %v1006_v6, %v992_v5 }
  0xcc   : > { %1628 = vmatpush.bf16.msrb.mxu1 %v4826_v8  ;;  %1642 = vmatpush.bf16.msrb.mxu2 %v4827_v12  ;;  %v2747_v8 = vld [vmem:[%s4651_s5 + $0x1] ss:$8 sm:$0x3]  ;;  %v4853_v12 = vld [vmem:[#allocation52_spill] sm:$0xff] }
  0xcd   : > { %1656 = vmatpush.bf16.msrb.mxu3 %v4828_v25 }
  0xce   : > { %1615 = vmatmul.bf16.vlgmr.msrb.gmra.mxu0 %v1536_v14 }
  0xcf   : > { %1663 = vmatpush.bf16.msra.mxu0 %v4829_v29  ;;  %1643 = vmatmul.bf16.vlgmr.msrb.gmra.mxu2 %v1536_v14  ;;  %v4838_v14 = vld [vmem:[#allocation37_spill] sm:$0xff]  ;;  %v1046_v60 = vpop.f32.mrf.mxu0  ;;  %v535_v29 = vunpack.c.h.bf16 %v3506_v30 }
  0xd0   : > { %1677 = vmatpush.bf16.msra.mxu1 %v4830_v38  ;;  %1691 = vmatpush.bf16.msra.mxu2 %v4831_v45  ;;  %v536_v38 = vunpack.c.h.bf16 %v3492_v47  ;;  %v4356_v45 = vperm.slane %v2747_v8, 0 }
  0xd1   : > { %1705 = vmatpush.bf16.msra.mxu3 %v4832_v32  ;;  %1629 = vmatmul.bf16.vlgmr.msrb.gmra.mxu1 %v1548_v23  ;;  %v1034_v43 = vpop.f32.mrf.mxu3  ;;  %v4358_v32 = vperm.slane %v2747_v8, 1  ;;  %v1818_v8 = vunpack.c.l.bf16 %v4257_v34  ;;  %v4868_v34 = vld [vmem:[#allocation17_spill] sm:$0xff] }
  0xd2   : > { %1657 = vmatmul.bf16.vlgmr.msrb.gmra.mxu3 %v1548_v23  ;;  %v1020_v23 = vpop.f32.mrf.mxu2  ;;  %v1060_v2 = vpop.f32.mrf.mxu1  ;;  %v1786_v50 = vmul.f32 %v4356_v45, %v535_v29 }
  0xd3   : > { %1664 = vmatpush.bf16.msra.mxu0 %v4833_v46  ;;  %v4335_v55 = vadd.f32 %v1034_v43, %v1020_v23  ;;  %v4341_v39 = vadd.f32 %v1060_v2, %v1046_v60  ;;  %v4859_v23 = vld [vmem:[#allocation58_spill] sm:$0xff] }
  0xd4   : > { %1678 = vmatpush.bf16.msra.mxu1 %v4834_v56  ;;  %1692 = vmatpush.bf16.msra.mxu2 %v4835_v57  ;;  %v1787_v56 = vmul.f32 %v4358_v32, %v536_v38  ;;  %v4855_v57 = vld [vmem:[#allocation54_spill] sm:$0xff] }
  0xd5   : > { %1706 = vmatpush.bf16.msra.mxu3 %v4836_v62  ;;  %v4856_v62 = vld [vmem:[#allocation55_spill] sm:$0xff] }
  0xd6   : > { %v1796_v6 = vadd.f32 %v1787_v56, %v1786_v50  ;;  %v4866_v50 = vld [vmem:[#allocation65_spill] sm:$0xff]  ;;  %v1824_v56 = vmul.f32 %v1818_v8, %v4356_v45  ;;  %v4874_v8 = vld [vmem:[#allocation71_spill] sm:$0xff] }
  0xd7   : > { %1665 = vmatpush.bf16.msra.mxu0 %v4837_v9  ;;  %v1048_v21 = vpop.f32.mrf.mxu0  ;;  %v556_v9 = vunpack.c.h.bf16 %v4247_v16 }
  0xd8   : > { %1679 = vmatpush.bf16.msra.mxu1 %v4838_v14  ;;  %1693 = vmatpush.bf16.msra.mxu2 %v4839_v27  ;;  %v4857_v14 = vld [vmem:[#allocation56_spill] sm:$0xff]  ;;  %v4858_v27 = vld [vmem:[#allocation57_spill] sm:$0xff] }
  0xd9   : > { %1707 = vmatpush.bf16.msra.mxu3 %v4840_v28  ;;  %v1088_v10 = vpop.f32.mrf.mxu3  ;;  %v534_v28 = vunpack.c.l.bf16 %v3492_v47  ;;  %1797 = vadd.xlane.f32.xlu0 %v1796_v6 }
  0xda   : > { %v1074_v41 = vpop.f32.mrf.mxu2  ;;  %v1062_v25 = vpop.f32.mrf.mxu1 }
  0xdb   : > { %1666 = vmatpush.bf16.msra.mxu0 %v4841_v35  ;;  %v4348_v7 = vadd.f32 %v1088_v10, %v1074_v41  ;;  %v4362_v46 = vadd.f32 %v1062_v25, %v1048_v21  ;;  %v1822_v35 = vmul.f32 %v4356_v45, %v556_v9  ;;  %v1785_v60 = vmul.f32 %v4358_v32, %v534_v28  ;;  %v4864_v21 = vld [vmem:[#allocation63_spill] sm:$0xff] }
  0xdc   : > { %1680 = vmatpush.bf16.msra.mxu1 %v4842_v51  ;;  %1694 = vmatpush.bf16.msra.mxu2 %v4843_v52 }
  0xdd   : > { %1708 = vmatpush.bf16.msra.mxu3 %v4844_v59 }
  0xdf   : > { %1667 = vmatpush.bf16.msra.mxu0 %v4845_v61  ;;  %v4860_v61 = vld [vmem:[#allocation59_spill] sm:$0xff] }
  0xe0   : > { %1681 = vmatpush.bf16.msra.mxu1 %v4846_v18  ;;  %1695 = vmatpush.bf16.msra.mxu2 %v4847_v24 }
  0xe1   : > { %1709 = vmatpush.bf16.msra.mxu3 %v4848_v0  ;;  %v4861_v0 = vld [vmem:[#allocation60_spill] sm:$0xff] }
  0xe2   : > { %v1076_v5 = vpop.f32.mrf.mxu2 }
  0xe3   : > { %1668 = vmatpush.bf16.msra.mxu0 %v4849_v42  ;;  %v4862_v42 = vld [vmem:[#allocation61_spill] sm:$0xff] }
  0xe4   : > { %1682 = vmatpush.bf16.msra.mxu1 %v4850_v26  ;;  %1696 = vmatpush.bf16.msra.mxu2 %v4851_v54  ;;  %v1792_v26 = vsel %vm1790_vm1, %v1785_v60, 0.0  ;;  %v4863_v54 = vld [vmem:[#allocation62_spill] sm:$0xff] }
  0xe5   : > { %1710 = vmatpush.bf16.msra.mxu3 %v4852_v3 }
  0xe7   : > { %1669 = vmatpush.bf16.msra.mxu0 %v4853_v12  ;;  %v1819_v12 = vunpack.c.l.bf16 %v4261_v44  ;;  %v4869_v44 = vld [vmem:[#allocation66_spill] sm:$0xff] }
  0xe8   : > { %1683 = vmatpush.bf16.msra.mxu1 %v4854_v4  ;;  %1697 = vmatpush.bf16.msra.mxu2 %v3890_v13  ;;  %v1090_v13 = vpop.f32.mrf.mxu3  ;;  %v4865_v4 = vld [vmem:[#allocation64_spill] sm:$0xff] }
  0xe9   : > { %1711 = vmatpush.bf16.msra.mxu3 %v3902_v36  ;;  %v557_v36 = vunpack.c.h.bf16 %v4251_v17 }
  0xeb   : > { %1670 = vmatpush.bf16.msra.mxu0 %v3923_v37  ;;  %v4376_v37 = vadd.f32 %v1090_v13, %v1076_v5  ;;  %v1823_v43 = vmul.f32 %v4358_v32, %v557_v36  ;;  %v1422_v10 = vpop.f32.mrf.mxu0  ;;  %v1778_v13 = vunpack.c.l.bf16 %v4868_v34 }
  0xec   : > { %1684 = vmatpush.bf16.msra.mxu1 %v3936_v19  ;;  %1698 = vmatpush.bf16.msra.mxu2 %v3938_v1  ;;  %v532_v19 = vld [vmem:[%s4651_s5] ss:$8 sm:$0x3]  ;;  %v533_v1 = vunpack.c.l.bf16 %v3506_v30  ;;  %v1423_v25 = vadd.f32 %v1422_v10, %v4315_v33  ;;  %v554_v33 = vunpack.c.l.bf16 %v4247_v16 }
  0xed   : > { %1712 = vmatpush.bf16.msra.mxu3 %v4855_v57  ;;  %v4391_v51 = vperm.slane %v532_v19, 0  ;;  %v4393_v52 = vperm.slane %v532_v19, 1  ;;  %v1831_v2 = vadd.f32 %v1823_v43, %v1822_v35  ;;  %v1825_v57 = vmul.f32 %v1819_v12, %v4358_v32  ;;  %v4870_v43 = vld [vmem:[#allocation67_spill] sm:$0xff] }
  0xee   : > { %1671 = vmatmul.bf16.vlgmr.msra.gmra.mxu0 %v4247_v16  ;;  %v1784_v59 = vmul.f32 %v4356_v45, %v533_v1  ;;  %v1789_v35 = vmul.f32 %v4358_v32, %v1778_v13  ;;  %v1820_v60 = vmul.f32 %v4356_v45, %v554_v33 }
  0xef   : > { %1719 = vmatpush.bf16.msrb.mxu0 %v4856_v62  ;;  %1699 = vmatmul.bf16.vlgmr.msra.gmra.mxu2 %v4247_v16  ;;  %v544_v18 = vmul.f32 %v4391_v51, %v535_v29  ;;  %v545_v24 = vmul.f32 %v4393_v52, %v536_v38  ;;  %v1436_v29 = vpop.f32.mrf.mxu1  ;;  %v4867_v62 = vld [vmem:[#allocation14_spill] sm:$0xff]  ;;  %v1835_v19 = vsel %vm1799_vm2, %v1825_v57, 0.0  ;;  %v561_v57 = vmul.f32 %v557_v36, %v4393_v52 }
  0xf0   : > { %1733 = vmatpush.bf16.msrb.mxu1 %v4857_v14  ;;  %1747 = vmatpush.bf16.msrb.mxu2 %v4858_v27  ;;  %v1791_v41 = vsel %vm1790_vm1, %v1784_v59, 0.0  ;;  %v1777_v5 = vunpack.c.l.bf16 %v4867_v62  ;;  %v4423_v6 = vadd.f32 %v1436_v29, %v1423_v25  ;;  %v555_v14 = vunpack.c.l.bf16 %v4251_v17  ;;  %v4875_v25 = vld [vmem:[#allocation72_spill] sm:$0xff]  ;;  %v4876_v29 = vld [vmem:[#allocation73_spill] sm:$0xff]  ;;  %v4878_v62 = vld [vmem:[#allocation75_spill] sm:$0xff] }
  0xf1   : > { %1761 = vmatpush.bf16.msrb.mxu3 %v4859_v23  ;;  %1685 = vmatmul.bf16.vlgmr.msra.gmra.mxu1 %v4251_v17  ;;  %v1793_v3 = vadd.f32 %v1792_v26, %v1791_v41  ;;  %v549_v38 = vadd.f32 %v545_v24, %v544_v18  ;;  %v1834_v27 = vsel %vm1799_vm2, %v1824_v56, 0.0  ;;  %v4872_v18 = vld [vmem:[#allocation69_spill] sm:$0xff]  ;;  %v4873_v24 = vld [vmem:[#allocation70_spill] sm:$0xff]  ;;  %v1801_v41 = vsel %vm1799_vm2, %v1789_v35, 0.0 }
  0xf2   : > { %1713 = vmatmul.bf16.vlgmr.msra.gmra.mxu3 %v4251_v17  ;;  %1832 = vadd.xlane.f32.xlu1 %v1831_v2  ;;  %v1788_v23 = vmul.f32 %v4356_v45, %v1777_v5  ;;  %v1836_v59 = vadd.f32 %v1835_v19, %v1834_v27  ;;  %v4871_v2 = vld [vmem:[#allocation68_spill] sm:$0xff]  ;;  %v1826_v26 = vsel %vm1790_vm1, %v1820_v60, 0.0  ;;  %v542_v34 = vmul.f32 %v4391_v51, %v533_v1 }
  0xf3   : > { %1720 = vmatpush.bf16.msrb.mxu0 %v4860_v61  ;;  %1794 = vadd.xlane.f32.xlu2 %v1793_v3  ;;  %v1821_v61 = vmul.f32 %v4358_v32, %v555_v14  ;;  %v1424_v3 = vpop.f32.mrf.mxu0  ;;  %v4879_v5 = vld [vmem:[#allocation76_spill] sm:$0xff]  ;;  %v543_v13 = vmul.f32 %v4393_v52, %v534_v28  ;;  %v558_v36 = vmul.f32 %v554_v33, %v4391_v51 }
  0xf4   : > { %1734 = vmatpush.bf16.msrb.mxu1 %v4861_v0  ;;  %1748 = vmatpush.bf16.msrb.mxu2 %v4862_v42  ;;  %v1450_v0 = vpop.f32.mrf.mxu2  ;;  %v1800_v42 = vsel %vm1799_vm2, %v1788_v23, 0.0  ;;  %v1425_v12 = vadd.f32 %v1424_v3, %v4327_v49 }
  0xf5   : > { %1762 = vmatpush.bf16.msrb.mxu3 %v4863_v54  ;;  %550 = vadd.xlane.f32.xlu0 %v549_v38  ;;  %v1827_v54 = vsel %vm1790_vm1, %v1821_v61, 0.0  ;;  %v1451_v45 = vadd.f32 %v1450_v0, %v4323_v58  ;;  %v1464_v32 = vpop.f32.mrf.mxu3  ;;  %v560_v58 = vmul.f32 %v556_v9, %v4391_v51  ;;  %v4880_v9 = vld [vmem:[#allocation77_spill] sm:$0xff]  ;;  %v546_v23 = vadd.f32 %v543_v13, %v542_v34 }
  0xf6   : > { %v1828_v10 = vadd.f32 %v1827_v54, %v1826_v26 }
  0xf7   : > { %1721 = vmatpush.bf16.msrb.mxu0 %v4864_v21  ;;  %v1438_v21 = vpop.f32.mrf.mxu1  ;;  %v1465_v38 = vadd.f32 %v1464_v32, %v1451_v45  ;;  %v565_v49 = vadd.f32 %v561_v57, %v560_v58 }
  0xf8   : > { %1735 = vmatpush.bf16.msrb.mxu1 %v4865_v4  ;;  %1749 = vmatpush.bf16.msrb.mxu2 %v4866_v50  ;;  %v1802_v4 = vadd.f32 %v1801_v41, %v1800_v42  ;;  %v4877_v50 = vld [vmem:[#allocation74_spill] sm:$0xff]  ;;  %v1439_v56 = vadd.f32 %v1438_v21, %v1425_v12 }
  0xf9   : > { %1763 = vmatpush.bf16.msrb.mxu3 %v4869_v44  ;;  %v1852_v33 = vmul.f32 %v1465_v38, %v1465_v38 }
  0xfa   : > { %1837 = vadd.xlane.f32.xlu1 %v1836_v59 }
  0xfb   : > { %1722 = vmatpush.bf16.msrb.mxu0 %v4870_v43  ;;  %1829 = vadd.xlane.f32.xlu2 %v1828_v10 }
  0xfc   : > { %1736 = vmatpush.bf16.msrb.mxu1 %v4871_v2  ;;  %1750 = vmatpush.bf16.msrb.mxu2 %v4872_v18  ;;  %v1452_v44 = vpop.f32.mrf.mxu2 }
  0xfd   : > { %1764 = vmatpush.bf16.msrb.mxu3 %v4873_v24  ;;  %1803 = vadd.xlane.f32.xlu0 %v1802_v4  ;;  %v1453_v27 = vadd.f32 %v1452_v44, %v4335_v55  ;;  %v1466_v19 = vpop.f32.mrf.mxu3 }
  0xff   : > { %1723 = vmatpush.bf16.msrb.mxu0 %v4874_v8  ;;  %v1467_v30 = vadd.f32 %v1466_v19, %v1453_v27 }
 0x100   : > { %1737 = vmatpush.bf16.msrb.mxu1 %v4875_v25  ;;  %1751 = vmatpush.bf16.msrb.mxu2 %v4876_v29 }
 0x101   : > { %1765 = vmatpush.bf16.msrb.mxu3 %v4877_v50  ;;  %v1854_v2 = vmul.f32 %v1467_v30, %v1467_v30 }
 0x102   : > { %566 = vadd.xlane.f32.xlu1 %v565_v49 }
 0x103   : > { %1724 = vmatpush.bf16.msrb.mxu0 %v4134_v48  ;;  %v559_v48 = vmul.f32 %v555_v14, %v4393_v52  ;;  %547 = vadd.xlane.f32.xlu2 %v546_v23  ;;  %v1853_v14 = vmul.f32 %v1439_v56, %v1439_v56 }
 0x104   : > { %1738 = vmatpush.bf16.msrb.mxu1 %v4878_v62  ;;  %1752 = vmatpush.bf16.msrb.mxu2 %v4879_v5 }
 0x105   : > { %1766 = vmatpush.bf16.msrb.mxu3 %v4880_v9  ;;  %v562_v47 = vadd.f32 %v559_v48, %v558_v36 }
 0x107   : > { %1725 = vmatpush.bf16.msrb.mxu0 %v4170_v63  ;;  %563 = vadd.xlane.f32.xlu0 %v562_v47 }
 0x108   : > { %1739 = vmatpush.bf16.msrb.mxu1 %v4174_v53  ;;  %1753 = vmatpush.bf16.msrb.mxu2 %v4176_v22 }
 0x109   : > { %1767 = vmatpush.bf16.msrb.mxu3 %v4188_v20 }
 0x10b   : > { %1726 = vmatpush.bf16.msrb.mxu0 %v4206_v31  ;;  %v1478_v22 = vpop.f32.mrf.mxu0 }
 0x10c   : > { %1740 = vmatpush.bf16.msrb.mxu1 %v4210_v11  ;;  %1754 = vmatpush.bf16.msrb.mxu2 %v4212_v40  ;;  %v1479_v53 = vadd.f32 %v1478_v22, %v4341_v39  ;;  %v1851_v11 = vmul.f32 %v4423_v6, %v4423_v6  ;;  %v2000_v22 = vlaneseq }
 0x10d   : > { %1768 = vmatpush.bf16.msrb.mxu3 %v4215_v15 }
 0x10e   : > { %1727 = vmatmul.bf16.vlgmr.msrb.gmra.mxu0 %v4247_v16  ;;  %v1492_v63 = vpop.f32.mrf.mxu1 }
 0x10f   : > { %1741 = vmatmul.bf16.vlgmr.msrb.gmra.mxu1 %v4251_v17  ;;  %1755 = vmatmul.bf16.vlgmr.msrb.gmra.mxu2 %v4247_v16  ;;  %v1493_v20 = vadd.f32 %v1492_v63, %v1479_v53 }
 0x110   : > { %1769 = vmatmul.bf16.vlgmr.msrb.gmra.mxu3 %v4251_v17 }
 0x111   : > { %v1855_v40 = vmul.f32 %v1493_v20, %v1493_v20 }
 0x112   : > { %v1506_v15 = vpop.f32.mrf.mxu2 }
 0x113   : > { %v4481_v31 = vadd.f32 %v1855_v40, %v1851_v11  ;;  %v1507_v55 = vadd.f32 %v1506_v15, %v4348_v7  ;;  %v1480_v1 = vpop.f32.mrf.mxu0  ;;  %v2001_v40 = vshrl.u32 %v2000_v22, 7 }
 0x114   : > { %v1481_v16 = vadd.f32 %v1480_v1, %v4362_v46 }
 0x115   : > { %v1520_v28 = vpop.f32.mrf.mxu3  ;;  %2924 = vrsqrt.f32 %v4481_v31  ;;  %vm1870_vm6 = vcmp.eq.f32.partialorder %v4481_v31, inf  ;;  %vm1872_vm7 = vcmp.eq.f32.partialorder %v4481_v31, 0.0 }
 0x116   : > { %v1494_v51 = vpop.f32.mrf.mxu1  ;;  %v1521_v17 = vadd.f32 %v1520_v28, %v1507_v55 }
 0x117   : > { %v1495_v52 = vadd.f32 %v1494_v51, %v1481_v16  ;;  %v2002_v16 = vadd.s32 8, %v2001_v40 }
 0x118   : > { %v1856_v39 = vmul.f32 %v1521_v17, %v1521_v17 }
 0x119   : > { %v1857_v35 = vmul.f32 %v1495_v52, %v1495_v52  ;;  %vm2007_vm4 = vcmp.lt.s32.totalorder %v2002_v16, 9 }
 0x11a   : > { %v4485_v43 = vadd.f32 %v1856_v39, %v1852_v33  ;;  %v1508_v59 = vpop.f32.mrf.mxu2 }
 0x11b   : > { %v4487_v6 = vadd.f32 %v1857_v35, %v1853_v14  ;;  %v1509_v60 = vadd.f32 %v1508_v59, %v4376_v37 }
 0x11c   : > { %2926 = vrsqrt.f32 %v4485_v43  ;;  %vm1882_vm8 = vcmp.eq.f32.partialorder %v4485_v43, inf  ;;  %vm1884_vm12 = vcmp.eq.f32.partialorder %v4485_v43, 0.0 }
 0x11d   : > { %v1522_v61 = vpop.f32.mrf.mxu3  ;;  %2928 = vrsqrt.f32 %v4487_v6  ;;  %vm1894_vm9 = vcmp.eq.f32.partialorder %v4487_v6, inf  ;;  %vm1896_vm13 = vcmp.eq.f32.partialorder %v4487_v6, 0.0 }
 0x11e   : > { %v1523_v7 = vadd.f32 %v1522_v61, %v1509_v60  ;;  %v2964_v61 = vmov 0.0  }
 0x120   : > { %v1858_v18 = vmul.f32 %v1523_v7, %v1523_v7  ;;  %v4529_v7 = vsel %vm2007_vm4, 1.0, %v2964_v61 }
 0x122   : > { %v4490_v24 = vadd.f32 %v1858_v18, %v1854_v2 }
 0x124   : > { %2930 = vrsqrt.f32 %v4490_v24  ;;  %vm1906_vm2 = vcmp.eq.f32.partialorder %v4490_v24, inf }
 0x12b   : > { %v4492_v46 = vpop.f32.mrf.mxu0 }
 0x12e   : > { %v4494_v0 = vpop.f32.mrf.mxu1 }
 0x132   : > { %v4496_v42 = vpop.f32.mrf.mxu2 }
 0x133   : > { %v4500_v26 = vpop.f32.mrf.mxu0 }
 0x135   : > { %v4498_v41 = vpop.f32.mrf.mxu3 }
 0x136   : > { %v4502_v54 = vpop.f32.mrf.mxu1 }
 0x13a   : > { %v4504_v45 = vpop.f32.mrf.mxu2 }
 0x13d   : > { %v4506_v37 = vpop.f32.mrf.mxu3 }
 0x14b   : > { %v4508_v3 = vpop.f32.mrf.mxu0 }
 0x14c   : > { %v1798_v10 = vpop.xlane.xlu0 %1797 }
 0x14d   : > { %v1810_v34 = vrot.slane %v1798_v10, 1 }
 0x14e   : > { %v4510_v32 = vpop.f32.mrf.mxu1 }
 0x152   : > { %v4512_v21 = vpop.f32.mrf.mxu2 }
 0x153   : > { %v4516_v29 = vpop.f32.mrf.mxu0 }
 0x155   : > { %v4514_v25 = vpop.f32.mrf.mxu3 }
 0x156   : > { %v4518_v38 = vpop.f32.mrf.mxu1 }
 0x15a   : > { %v4520_v49 = vpop.f32.mrf.mxu2 }
 0x15d   : > { %v4522_v5 = vpop.f32.mrf.mxu3 }
 0x165   : > { %v1833_v8 = vpop.xlane.xlu1 %1832 }
 0x166   : > { %v1795_v12 = vpop.xlane.xlu2 %1794  ;;  %v1843_v56 = vrot.slane %v1833_v8, 1  ;;  %v1575_v8 = vadd.f32 %v4494_v0, %v4492_v46 }
 0x167   : > { %v1809_v62 = vrot.slane %v1795_v12, 1 }
 0x168   : > { %v551_v4 = vpop.xlane.xlu0 %550 }
 0x169   : > { %v1811_v30 = vsel %vm1808_vm3, %v1809_v62, %v1810_v34  ;;  %v1631_v62 = vadd.f32 %v4510_v32, %v4508_v3  ;;  %v1577_v3 = vadd.f32 %v4502_v54, %v4500_v26 }
 0x16b   : > { %v1672_v44 = vpop.f32.mrf.mxu0 }
 0x16d   : > { %v1838_v50 = vpop.xlane.xlu1 %1837 }
 0x16e   : > { %v1845_v58 = vrot.slane %v1838_v50, 1  ;;  %v1830_v57 = vpop.xlane.xlu2 %1829  ;;  %v1686_v27 = vpop.f32.mrf.mxu1 }
 0x16f   : > { %v1842_v19 = vrot.slane %v1830_v57, 1 }
 0x170   : > { %v1804_v13 = vpop.xlane.xlu0 %1803  ;;  %v1846_v9 = vsel %vm1808_vm3, %v1843_v56, %v1845_v58 }
 0x171   : > { %v1812_v36 = vrot.slane %v1804_v13, 1  ;;  %v1844_v1 = vsel %vm1808_vm3, %v1842_v19, %v1843_v56  ;;  %v1673_v56 = vadd.f32 %v1672_v44, %v1575_v8  ;;  %v1603_v44 = vadd.f32 %v4498_v41, %v4496_v42 }
 0x172   : > { %v1700_v51 = vpop.f32.mrf.mxu2  ;;  %v1659_v42 = vadd.f32 %v4514_v25, %v4512_v21  ;;  %v1633_v41 = vadd.f32 %v4518_v38, %v4516_v29  ;;  %v1605_v25 = vadd.f32 %v4506_v37, %v4504_v45 }
 0x173   : > { %v1813_v47 = vsel %vm1808_vm3, %v1810_v34, %v1812_v36  ;;  %v1674_v35 = vpop.f32.mrf.mxu0  ;;  %vm1908_vm3 = vcmp.eq.f32.partialorder %v4490_v24, 0.0 }
 0x174   : > { %v1817_v53 = vadd.f32 %v1813_v47, %v551_v4  ;;  %v4535_v4 = vpop.eup %2924 }
 0x175   : > { %v567_v48 = vpop.xlane.xlu1 %566  ;;  %v1714_v33 = vpop.f32.mrf.mxu3  ;;  %v1864_v13 = vmul.f32 %v4535_v4, %v4481_v31 }
 0x176   : > { %v1850_v23 = vadd.f32 %v1846_v9, %v567_v48  ;;  %v548_v20 = vpop.xlane.xlu2 %547  ;;  %v1988_v15 = vand.u32 2147483647, %v1817_v53  ;;  %v1688_v2 = vpop.f32.mrf.mxu1  ;;  %v1687_v48 = vadd.f32 %v1686_v27, %v1673_v56  ;;  %v1701_v27 = vadd.f32 %v1700_v51, %v1603_v44 }
 0x177   : > { %v1816_v11 = vadd.f32 %v1811_v30, %v548_v20  ;;  %v4542_v9 = vpop.eup %2926  ;;  %v1865_v22 = vmul.f32 %v4535_v4, %v1864_v13  ;;  %v1675_v20 = vadd.f32 %v1674_v35, %v1577_v3 }
 0x178   : > { %v1992_v63 = vand.u32 2147483647, %v1850_v23  ;;  %v1990_v17 = vmax.f32 %v1988_v15, 1e-08  ;;  %v4544_v47 = vpop.eup %2928  ;;  %v1876_v53 = vmul.f32 %v4542_v9, %v4485_v43 }
 0x179   : > { %v1987_v28 = vand.u32 2147483647, %v1816_v11  ;;  %v1888_v40 = vmul.f32 %v4544_v47, %v4487_v6  ;;  %v1866_v15 = vmul.f32 0.5, %v1865_v22  ;;  %v4565_v21 = vpop.eup %2930 }
 0x17a   : > { %v1994_v55 = vmax.f32 %v1992_v63, 1e-08  ;;  %v564_v52 = vpop.xlane.xlu0 %563  ;;  %v1702_v34 = vpop.f32.mrf.mxu2  ;;  %v1915_v63 = vmul.f32 %v1687_v48, %v1687_v48  ;;  %v1900_v8 = vmul.f32 %v4565_v21, %v4490_v24 }
 0x17b   : > { %v1849_v39 = vadd.f32 %v1844_v1, %v564_v52  ;;  %v1989_v60 = vmax.f32 %v1987_v28, 1e-08  ;;  %v1715_v1 = vadd.f32 %v1714_v33, %v1701_v27  ;;  %v1867_v35 = vsub.f32 1.5, %v1866_v15 }
 0x17c   : > { %v1996_v14 = vsub.f32 %v1990_v17, %v1994_v55  ;;  %v1877_v55 = vmul.f32 %v4542_v9, %v1876_v53  ;;  %v1689_v17 = vadd.f32 %v1688_v2, %v1675_v20 }
 0x17d   : > { %v1991_v59 = vand.u32 2147483647, %v1849_v39  ;;  %v1716_v46 = vpop.f32.mrf.mxu3  ;;  %v1889_v39 = vmul.f32 %v4544_v47, %v1888_v40  ;;  %v1916_v33 = vmul.f32 %v1715_v1, %v1715_v1 }
 0x17e   : > { %v1998_v18 = vand.u32 2147483647, %v1996_v14 }
 0x17f   : > { %v1993_v10 = vmax.f32 %v1991_v59, 1e-08  ;;  %v1878_v59 = vmul.f32 0.5, %v1877_v55 }
 0x180   : > { %v2029_v12 = vmul.f32 %v4529_v7, %v1998_v18  ;;  %v1917_v18 = vmul.f32 %v1689_v17, %v1689_v17 }
 0x181   : > { %v1995_v50 = vsub.f32 %v1989_v60, %v1993_v10  ;;  %v1703_v60 = vadd.f32 %v1702_v34, %v1605_v25  ;;  %v1890_v10 = vmul.f32 0.5, %v1889_v39 }
 0x182   : > { %v2032_v57 = vsel %vm2030_vm5, %v2029_v12, 0.0  ;;  %v1661_v12 = vadd.f32 %v4522_v5, %v4520_v49  ;;  %v1901_v49 = vmul.f32 %v4565_v21, %v1900_v8 }
 0x183   : > { %v1997_v58 = vand.u32 2147483647, %v1995_v50 }
 0x184   : > { %v1902_v3 = vmul.f32 0.5, %v1901_v49 }
 0x185   : > { %v2031_v36 = vsel %vm2030_vm5, %v1997_v58, 0.0  ;;  %v1868_v58 = vmul.f32 %v4535_v4, %v1867_v35 }
 0x186   : > { %v2033_v30 = vadd.f32 %v2032_v57, %v2031_v36  ;;  %v1879_v57 = vsub.f32 1.5, %v1878_v59  ;;  %v1891_v36 = vsub.f32 1.5, %v1890_v10 }
 0x188   : > { %2034 = vadd.xlane.f32.xlu2 %v2033_v30  ;;  %v1880_v4 = vmul.f32 %v4542_v9, %v1879_v57  ;;  %v1892_v44 = vmul.f32 %v4544_v47, %v1891_v36  ;;  %v1873_v47 = vand.u32 2147483648, %v4481_v31 }
 0x18b   : > { %v1728_v0 = vpop.f32.mrf.mxu0 }
 0x18c   : > { %v1729_v19 = vadd.f32 %v1728_v0, %v1631_v62  ;;  %v1742_v23 = vpop.f32.mrf.mxu1  ;;  %v1717_v62 = vadd.f32 %v1716_v46, %v1703_v60 }
 0x18e   : > { %v1743_v32 = vadd.f32 %v1742_v23, %v1729_v19  ;;  %v1869_v19 = vmul.f32 %v1868_v58, %v4481_v31  ;;  %v1918_v23 = vmul.f32 %v1717_v62, %v1717_v62 }
 0x190   : > { %v1919_v11 = vmul.f32 %v1743_v32, %v1743_v32 }
 0x192   : > { %v4560_v26 = vadd.f32 %v1919_v11, %v1915_v63  ;;  %v1756_v54 = vpop.f32.mrf.mxu2  ;;  %v1871_v63 = vsel %vm1870_vm6, %v4481_v31, %v1869_v19  ;;  %v1881_v11 = vmul.f32 %v1880_v4, %v4485_v43 }
 0x193   : > { %v1757_v28 = vadd.f32 %v1756_v54, %v1659_v42  ;;  %v1770_v16 = vpop.f32.mrf.mxu3  ;;  %v1730_v51 = vpop.f32.mrf.mxu0  ;;  %v1893_v42 = vmul.f32 %v1892_v44, %v4487_v6  ;;  %v1874_v1 = vsel %vm1872_vm7, %v1873_v47, %v1871_v63 }
 0x194   : > { %2932 = vrsqrt.f32 %v4560_v26  ;;  %v1731_v52 = vadd.f32 %v1730_v51, %v1633_v41  ;;  %v1744_v38 = vpop.f32.mrf.mxu1  ;;  %v1903_v41 = vsub.f32 1.5, %v1902_v3  ;;  %vm1934_vm10 = vcmp.eq.f32.partialorder %v4560_v26, inf }
 0x195   : > { %v1771_v29 = vadd.f32 %v1770_v16, %v1757_v28  ;;  %v1883_v16 = vsel %vm1882_vm8, %v4485_v43, %v1881_v11  ;;  %v1937_v17 = vand.u32 2147483648, %v4560_v26  ;;  %v1895_v31 = vsel %vm1894_vm9, %v4487_v6, %v1893_v42 }
 0x196   : > { %v1745_v14 = vadd.f32 %v1744_v38, %v1731_v52  ;;  %v1904_v39 = vmul.f32 %v4565_v21, %v1903_v41  ;;  %vm1936_vm11 = vcmp.eq.f32.partialorder %v4560_v26, 0.0  ;;  %v1885_v38 = vand.u32 2147483648, %v4485_v43 }
 0x197   : > { %v1920_v61 = vmul.f32 %v1771_v29, %v1771_v29  ;;  %v1911_v21 = vmax.f32 %v1874_v1, 1e-08 }
 0x198   : > { %v1921_v2 = vmul.f32 %v1745_v14, %v1745_v14  ;;  %v1897_v14 = vand.u32 2147483648, %v4487_v6 }
 0x199   : > { %v4573_v50 = vadd.f32 %v1920_v61, %v1916_v33  ;;  %v1886_v61 = vsel %vm1884_vm12, %v1885_v38, %v1883_v16 }
 0x19a   : > { %v2933_v45 = vpop.eup %2932  ;;  %v4575_v37 = vadd.f32 %v1921_v2, %v1917_v18  ;;  %v1758_v56 = vpop.f32.mrf.mxu2  ;;  %v1898_v18 = vsel %vm1896_vm13, %v1897_v14, %v1895_v31  ;;  %v1912_v57 = vmax.f32 %v1886_v61, 1e-08 }
 0x19b   : > { %2934 = vrsqrt.f32 %v4573_v50  ;;  %v1759_v34 = vadd.f32 %v1758_v56, %v1661_v12  ;;  %v1928_v13 = vmul.f32 %v2933_v45, %v4560_v26  ;;  %v1772_v0 = vpop.f32.mrf.mxu3  ;;  %vm1946_vm14 = vcmp.eq.f32.partialorder %v4573_v50, inf }
 0x19c   : > { %2936 = vrsqrt.f32 %v4575_v37  ;;  %vm1948_vm15 = vcmp.eq.f32.partialorder %v4573_v50, 0.0  ;;  %v1949_v43 = vand.u32 2147483648, %v4573_v50  ;;  %vm1958_vm0 = vcmp.eq.f32.partialorder %v4575_v37, inf }
 0x19d   : > { %v1773_v5 = vadd.f32 %v1772_v0, %v1759_v34  ;;  %v1929_v48 = vmul.f32 %v2933_v45, %v1928_v13  ;;  %v1961_v56 = vand.u32 2147483648, %v4575_v37  ;;  %vm1960_vm1 = vcmp.eq.f32.partialorder %v4575_v37, 0.0 }
 0x19f   : > { %v1922_v30 = vmul.f32 %v1773_v5, %v1773_v5  ;;  %v1930_v46 = vmul.f32 0.5, %v1929_v48  ;;  %v1913_v5 = vmax.f32 %v1898_v18, 1e-08 }
 0x1a1   : > { %v2935_v32 = vpop.eup %2934  ;;  %v4585_v22 = vadd.f32 %v1922_v30, %v1918_v23  ;;  %v1931_v53 = vsub.f32 1.5, %v1930_v46  ;;  %v1909_v30 = vand.u32 2147483648, %v4490_v24 }
 0x1a2   : > { %v2937_v27 = vpop.eup %2936  ;;  %v1940_v20 = vmul.f32 %v2935_v32, %v4573_v50 }
 0x1a3   : > { %2938 = vrsqrt.f32 %v4585_v22  ;;  %v1932_v9 = vmul.f32 %v2933_v45, %v1931_v53  ;;  %v1952_v40 = vmul.f32 %v2937_v27, %v4575_v37  ;;  %vm1970_vm4 = vcmp.eq.f32.partialorder %v4585_v22, inf }
 0x1a4   : > { %v1941_v54 = vmul.f32 %v2935_v32, %v1940_v20  ;;  %vm1972_vm5 = vcmp.eq.f32.partialorder %v4585_v22, 0.0 }
 0x1a5   : > { %v1933_v15 = vmul.f32 %v1932_v9, %v4560_v26  ;;  %v1953_v55 = vmul.f32 %v2937_v27, %v1952_v40 }
 0x1a6   : > { %v1942_v28 = vmul.f32 0.5, %v1941_v54 }
 0x1a7   : > { %v1935_v51 = vsel %vm1934_vm10, %v4560_v26, %v1933_v15  ;;  %v1954_v52 = vmul.f32 0.5, %v1953_v55  ;;  %v1905_v26 = vmul.f32 %v1904_v39, %v4490_v24 }
 0x1a8   : > { %v1943_v25 = vsub.f32 1.5, %v1942_v28  ;;  %v1938_v35 = vsel %vm1936_vm11, %v1937_v17, %v1935_v51 }
 0x1a9   : > { %v2939_v29 = vpop.eup %2938  ;;  %v1955_v59 = vsub.f32 1.5, %v1954_v52  ;;  %v1975_v12 = vmax.f32 %v1938_v35, 1e-08 }
 0x1aa   : > { %v1944_v33 = vmul.f32 %v2935_v32, %v1943_v25  ;;  %v1964_v60 = vmul.f32 %v2939_v29, %v4585_v22  ;;  %v1973_v32 = vand.u32 2147483648, %v4585_v22 }
 0x1ab   : > { %v1956_v2 = vmul.f32 %v2937_v27, %v1955_v59  ;;  %v1979_v49 = vsub.f32 %v1911_v21, %v1975_v12 }
 0x1ac   : > { %v1945_v10 = vmul.f32 %v1944_v33, %v4573_v50  ;;  %v1965_v8 = vmul.f32 %v2939_v29, %v1964_v60 }
 0x1ad   : > { %v1957_v6 = vmul.f32 %v1956_v2, %v4575_v37 }
 0x1ae   : > { %v1947_v45 = vsel %vm1946_vm14, %v4573_v50, %v1945_v10  ;;  %v1966_v58 = vmul.f32 0.5, %v1965_v8  ;;  %v1907_v50 = vsel %vm1906_vm2, %v4490_v24, %v1905_v26 }
 0x1af   : > { %v1950_v62 = vsel %vm1948_vm15, %v1949_v43, %v1947_v45  ;;  %v1959_v34 = vsel %vm1958_vm0, %v4575_v37, %v1957_v6  ;;  %v1983_v37 = vand.u32 2147483647, %v1979_v49  ;;  %v1910_v3 = vsel %vm1908_vm3, %v1909_v30, %v1907_v50 }
 0x1b0   : > { %v1962_v13 = vsel %vm1960_vm1, %v1961_v56, %v1959_v34  ;;  %v1967_v0 = vsub.f32 1.5, %v1966_v58  ;;  %v1976_v36 = vmax.f32 %v1950_v62, 1e-08  ;;  %v1914_v9 = vmax.f32 %v1910_v3, 1e-08 }
 0x1b1   : > { %v1977_v48 = vmax.f32 %v1962_v13, 1e-08 }
 0x1b2   : > { %v1968_v19 = vmul.f32 %v2939_v29, %v1967_v0  ;;  %v1980_v23 = vsub.f32 %v1912_v57, %v1976_v36 }
 0x1b3   : > { %v1981_v4 = vsub.f32 %v1913_v5, %v1977_v48 }
 0x1b4   : > { %v1969_v46 = vmul.f32 %v1968_v19, %v4585_v22  ;;  %v1984_v44 = vand.u32 2147483647, %v1980_v23 }
 0x1b5   : > { %v1985_v53 = vand.u32 2147483647, %v1981_v4 }
 0x1b6   : > { %v1971_v27 = vsel %vm1970_vm4, %v4585_v22, %v1969_v46  ;;  %v2016_v63 = vadd.f32 %v1984_v44, %v1983_v37 }
 0x1b7   : > { %v1974_v20 = vsel %vm1972_vm5, %v1973_v32, %v1971_v27  ;;  %v2014_v11 = vmul.f32 %v4529_v7, %v1985_v53 }
 0x1b8   : > { %v1978_v24 = vmax.f32 %v1974_v20, 1e-08 }
 0x1b9   : > { %v2017_v40 = vadd.f32 %v2016_v63, %v2014_v11 }
 0x1ba   : > { %v1982_v47 = vsub.f32 %v1914_v9, %v1978_v24 }
 0x1bc   : > { %v1986_v42 = vand.u32 2147483647, %v1982_v47 }
 0x1be   : > { %v2015_v41 = vmul.f32 %v4529_v7, %v1986_v42 }
 0x1c0   : > { %v2018_v54 = vadd.f32 %v2017_v40, %v2015_v41 }
 0x1c2   : > { %2019 = vadd.xlane.f32.xlu1 %v2018_v54 }
 0x1fb   : > { %v2035_v15 = vpop.xlane.xlu2 %2034 }
 0x1fc   : > { %v2036_v55 = vrot.slane %v2035_v15, 4 }
 0x1fe   : > { %v2037_v1 = vadd.f32 %v2036_v55, %v2035_v15 }
 0x200   : > { %v2038_v28 = vrot.slane %v2037_v1, 2 }
 0x202   : > { %v2039_v17 = vadd.f32 %v2038_v28, %v2037_v1 }
 0x204   : > { %v2040_v39 = vrot.slane %v2039_v17, 1 }
 0x206   : > { %v2041_v38 = vadd.f32 %v2040_v39, %v2039_v17 }
 0x235   : > { %v2020_v16 = vpop.xlane.xlu1 %2019 }
 0x236   : > { %v2021_v22 = vrot.slane %v2020_v16, 4 }
 0x238   : > { %v2022_v51 = vadd.f32 %v2021_v22, %v2020_v16 }
 0x23a   : > { %v2023_v52 = vrot.slane %v2022_v51, 2 }
 0x23c   : > { %v2024_v31 = vadd.f32 %v2023_v52, %v2022_v51 }
 0x23e   : > { %v2025_v25 = vrot.slane %v2024_v31, 1 }
 0x240   : > { %v2026_v29 = vadd.f32 %v2025_v25, %v2024_v31 }
 0x242   : > { %2895 = vpush %v2026_v29 }
 0x243   : > { %2897 = vpush %v2041_v38 }
 0x273   : > { %s2896_s28 = spop %2895 }
 0x274   : > { %s2898_s30 = spop %2897 }
 0x275   : > { %s2043_s10 = sadd.f32 %s2898_s30, %s2896_s28 }
 0x277   : > { %v2044_v7 = vstv %s2043_s10 }
 0x278   : > { %2045 = vst [vmem:[%s419_s9] sm:$0xff] %v2044_v7 }
 0x279 PF: > { %s16_s23 = sadd.s32 1, %s2962_s23   ;;  %s4881_s21 = smov %s2958_s22 }
 0x27a   : > { %p13_p5 = scmp.ge.s32.totalorder %s16_s23, 4   ;;  %s4882_s22 = smov %s4884_s24 }
 0x27c   :  { %15 = sbr.rel (!%p13_p5) target bundleno = 2 (0x2), region = 84 }

</bundles_post_ra>
